<compile_context>
chip_gen: v5e
topology: v5e:2x2
jax: 0.10.0
libtpu: 0.0.40
codegen_flags: <defaults>
</compile_context>

<pallas_src>
from functools import partial

import numpy as np

import jax
import jax.numpy as jnp
from jax import lax
from jax.experimental import pallas as pl
from jax.experimental.pallas import tpu as pltpu


def _lstm_bn_kernel(x_ref, wih_ref, whh_ref, b_ref, gamma_ref, beta_ref,
                    y_ref, gx_scr, *, seq_len, batch):
    """Fused group-LSTM (all groups at once, block-diagonal weights) + BatchNorm1d.

    x_ref:     (T*B, Fin)      time-major input slab, row = t*B + b
    wih_ref:   (Fin, 4*G*H)    block-diagonal input->gate weights
    whh_ref:   (G*H, 4*G*H)    block-diagonal hidden->gate weights
    b_ref:     (1, 4*G*H)      combined bias (b_ih + b_hh), gate-major columns
    gamma_ref: (1, G*H)        BN scale (module channel ordering)
    beta_ref:  (1, G*H)        BN shift
    y_ref:     (T*B, G*H)      normalized output slab
    gx_scr:    (T*B, 4*G*H)    VMEM scratch for the hoisted input projection
    Gate column layout: gate*(G*H) + out_col(g, h); gate order i, f, g, o.
    """
    GH = whh_ref.shape[0]

    # (1) Hoisted input projection for ALL timesteps: one lane-dense (128-wide)
    #     MXU matmul, bias folded in, off the recurrent critical path.
    gx_scr[...] = (
        jnp.dot(x_ref[...], wih_ref[...], preferred_element_type=jnp.float32)
        + b_ref[...]
    )

    whh = whh_ref[...]                                    # hoist weight load
    h0 = jnp.zeros((batch, GH), jnp.float32)
    c0 = jnp.zeros((batch, GH), jnp.float32)

    # (2) Recurrence: only h @ W_hh + elementwise remain serial; h/c stay in
    #     vregs via the loop carry.
    def step(t, carry):
        h, c = carry
        row = pl.multiple_of(t * batch, batch)
        gates = gx_scr[pl.ds(row, batch), :] + jnp.dot(
            h, whh, preferred_element_type=jnp.float32)   # (B, 4*G*H) = 128 lanes
        i = jax.nn.sigmoid(gates[:, 0:GH])
        f = jax.nn.sigmoid(gates[:, GH:2 * GH])
        cand = jnp.tanh(gates[:, 2 * GH:3 * GH])
        o = jax.nn.sigmoid(gates[:, 3 * GH:4 * GH])
        c = f * c + i * cand
        h = o * jnp.tanh(c)
        y_ref[pl.ds(row, batch), :] = h
        return (h, c)

    lax.fori_loop(0, seq_len, step, (h0, c0),
                  unroll=(True if seq_len <= 16 else 8))

    # (3) Fused BatchNorm1d (training-mode batch stats, biased var, eps=1e-5)
    #     over the T*B rows already resident in VMEM.
    y = y_ref[...]
    inv_n = 1.0 / float(seq_len * batch)
    mean = jnp.sum(y, axis=0, keepdims=True) * inv_n
    yc = y - mean
    var = jnp.sum(yc * yc, axis=0, keepdims=True) * inv_n
    inv_std = lax.rsqrt(var + 1e-5)
    y_ref[...] = yc * inv_std * gamma_ref[...] + beta_ref[...]


def group_lstm_bn_layer(x_2d, w_ih, w_hh, b, gamma, beta, *, seq_len, batch):
    """One GroupRNN layer (all groups fused) + its BatchNorm, as one pallas_call."""
    TB, Fin = x_2d.shape
    GH, G4H = w_hh.shape
    kernel = partial(_lstm_bn_kernel, seq_len=seq_len, batch=batch)
    return pl.pallas_call(
        kernel,
        out_shape=jax.ShapeDtypeStruct((TB, GH), jnp.float32),
        in_specs=[
            pl.BlockSpec((TB, Fin), lambda: (0, 0)),
            pl.BlockSpec((Fin, G4H), lambda: (0, 0)),
            pl.BlockSpec((GH, G4H), lambda: (0, 0)),
            pl.BlockSpec((1, G4H), lambda: (0, 0)),
            pl.BlockSpec((1, GH), lambda: (0, 0)),
            pl.BlockSpec((1, GH), lambda: (0, 0)),
        ],
        out_specs=pl.BlockSpec((TB, GH), lambda: (0, 0)),
        scratch_shapes=[pltpu.VMEM((TB, G4H), jnp.float32)],
    )(x_2d, w_ih, w_hh, b, gamma, beta)


def group_rnn_forward(x, p):
    """GroupRNN.forward: (B, T, F) -> (B, T, hidden_size)."""
    B, T, F = x.shape
    # Time-major 2D slab (T*B, F), row = t*B + b.  Row order does not affect
    # BatchNorm statistics, so layers 1 and 2 chain with no layout ops at all;
    # the only transposes in the whole forward are at the two ends.
    x_tb = jnp.transpose(x, (1, 0, 2)).reshape(T * B, F)
    y1 = group_lstm_bn_layer(x_tb, p["w_ih1"], p["w_hh1"], p["b1"],
                             p["gamma1"], p["beta1"], seq_len=T, batch=B)
    y2 = group_lstm_bn_layer(y1, p["w_ih2"], p["w_hh2"], p["b2"],
                             p["gamma2"], p["beta2"], seq_len=T, batch=B)
    C = y2.shape[-1]
    return jnp.transpose(y2.reshape(T, B, C), (1, 0, 2))


def build_fused_lstm_params(w_ih, w_hh, b_ih, b_hh, interleave_output):
    """Fuse G per-group PyTorch-layout LSTM params into block-diagonal weights.

    w_ih: (G, 4H, Din), w_hh: (G, 4H, H), b_ih/b_hh: (G, 4H)  (PyTorch layouts).
    Fused gate column = gate*(G*H) + out_col(g, h) with
      out_col = h*G + g  if interleave_output  (torch.stack(dim=-1)+flatten)
      out_col = g*H + h  otherwise             (torch.cat(dim=-1))
    The fused hidden-state column layout equals out_col, so the kernel's output
    is already in the module's channel ordering (no post-kernel permute) and
    gamma/beta/chunking of the next layer apply directly.
    """
    w_ih = np.asarray(w_ih, np.float32)
    w_hh = np.asarray(w_hh, np.float32)
    b_ih = np.asarray(b_ih, np.float32)
    b_hh = np.asarray(b_hh, np.float32)
    G, fourH, Din = w_ih.shape
    H = fourH // 4
    GH = G * H

    if interleave_output:
        out_col = np.arange(H)[None, :] * G + np.arange(G)[:, None]   # (G, H): h*G+g
    else:
        out_col = np.arange(G)[:, None] * H + np.arange(H)[None, :]   # (G, H): g*H+h

    W_ih = np.zeros((G * Din, 4 * GH), np.float32)
    W_hh = np.zeros((GH, 4 * GH), np.float32)
    b = np.zeros((4 * GH,), np.float32)
    for g in range(G):
        in_rows = np.arange(g * Din, (g + 1) * Din)
        for gate in range(4):
            cols = gate * GH + out_col[g]                              # (H,)
            wi = w_ih[g, gate * H:(gate + 1) * H, :]                   # (H_out, Din)
            wh = w_hh[g, gate * H:(gate + 1) * H, :]                   # (H_out, H_in)
            W_ih[np.ix_(in_rows, cols)] = wi.T                         # (Din, H_out)
            W_hh[np.ix_(out_col[g], cols)] = wh.T                      # (H_in, H_out)
            b[cols] = b_ih[g, gate * H:(gate + 1) * H] + b_hh[g, gate * H:(gate + 1) * H]

    return jnp.asarray(W_ih), jnp.asarray(W_hh), jnp.asarray(b)[None, :]


if __name__ == "__main__":
    # Module config (small but consistent with GroupRNN.__init__)
    input_size, hidden_size, split_group = 16, 32, 2
    B, T = 2, 8
    G = split_group
    Fin_t = input_size // G        # per-group input size
    H = hidden_size // G           # per-group hidden size (is_causal=True)

    key = jax.random.PRNGKey(0)
    kx, kp = jax.random.split(key)
    wkeys = jax.random.split(kp, 8)
    k = 1.0 / jnp.sqrt(jnp.float32(H))   # PyTorch LSTM default init range

    def u(kk, shape):
        return jax.random.uniform(kk, shape, jnp.float32, -k, k)

    # PyTorch parameter layout: weight_ih (4H, in), weight_hh (4H, H), biases (4H,)
    w_ih1 = u(wkeys[0], (G, 4 * H, Fin_t))
    w_hh1 = u(wkeys[1], (G, 4 * H, H))
    b_ih1 = u(wkeys[2], (G, 4 * H))
    b_hh1 = u(wkeys[3], (G, 4 * H))
    w_ih2 = u(wkeys[4], (G, 4 * H, H))
    w_hh2 = u(wkeys[5], (G, 4 * H, H))
    b_ih2 = u(wkeys[6], (G, 4 * H))
    b_hh2 = u(wkeys[7], (G, 4 * H))

    # Host-side, one-time fusion of per-group params into block-diagonal,
    # layout-encoding fused weights (layer 1: interleaved stack ordering,
    # layer 2: concatenated ordering).
    W_ih1, W_hh1, b1 = build_fused_lstm_params(w_ih1, w_hh1, b_ih1, b_hh1,
                                               interleave_output=True)
    W_ih2, W_hh2, b2 = build_fused_lstm_params(w_ih2, w_hh2, b_ih2, b_hh2,
                                               interleave_output=False)

    params = dict(
        w_ih1=W_ih1, w_hh1=W_hh1, b1=b1,
        w_ih2=W_ih2, w_hh2=W_hh2, b2=b2,
        gamma1=jnp.ones((1, hidden_size), jnp.float32),   # BatchNorm1d defaults
        beta1=jnp.zeros((1, hidden_size), jnp.float32),
        gamma2=jnp.ones((1, hidden_size), jnp.float32),
        beta2=jnp.zeros((1, hidden_size), jnp.float32),
    )

    x = jax.random.normal(kx, (B, T, input_size), jnp.float32)

    fwd = jax.jit(group_rnn_forward)
    out = jax.block_until_ready(fwd(x, params))

    assert out.shape == (B, T, hidden_size), out.shape
    assert bool(jnp.all(jnp.isfinite(out)))
    print("KERNEL_OK")
</pallas_src>

<mosaic_0001>
module attributes {stable_mosaic.version = 11 : i64} {
  func.func @_lstm_bn_kernel(%arg0: memref<16x32xf32, #tpu.memory_space<vmem>>, %arg1: memref<32x128xf32, #tpu.memory_space<vmem>>, %arg2: memref<32x128xf32, #tpu.memory_space<vmem>>, %arg3: memref<1x128xf32, #tpu.memory_space<vmem>>, %arg4: memref<1x32xf32, #tpu.memory_space<vmem>>, %arg5: memref<1x32xf32, #tpu.memory_space<vmem>>, %arg6: memref<16x32xf32, #tpu.memory_space<vmem>>, %arg7: memref<16x128xf32, #tpu.memory_space<vmem>>) attributes {dimension_semantics = [], scalar_prefetch = 0 : i64, scratch_operands = 1 : i64, tpu.core_type = #tpu.core_type<tc>} {
    %c0 = arith.constant 0 : index
    %c0_0 = arith.constant 0 : index
    %0 = vector.load %arg0[%c0, %c0_0] : memref<16x32xf32, #tpu.memory_space<vmem>>, vector<16x32xf32>
    %c0_1 = arith.constant 0 : index
    %c0_2 = arith.constant 0 : index
    %1 = vector.load %arg1[%c0_1, %c0_2] : memref<32x128xf32, #tpu.memory_space<vmem>>, vector<32x128xf32>
    %cst = arith.constant dense<0.000000e+00> : vector<16x128xf32>
    %2 = tpu.matmul %0, %1, %cst {dimension_numbers = #tpu.dot_dimension_numbers<[1], [0], [0], [1], [0, 0, 1, 1], [], []>} : vector<16x32xf32>, vector<32x128xf32>, vector<16x128xf32> -> vector<16x128xf32>
    %c0_3 = arith.constant 0 : index
    %c0_4 = arith.constant 0 : index
    %3 = vector.load %arg3[%c0_3, %c0_4] : memref<1x128xf32, #tpu.memory_space<vmem>>, vector<1x128xf32>
    %4 = vector.broadcast %3 : vector<1x128xf32> to vector<16x128xf32>
    %5 = arith.addf %2, %4 : vector<16x128xf32>
    %c0_5 = arith.constant 0 : index
    %c0_6 = arith.constant 0 : index
    %6 = vector.load %arg7[%c0_5, %c0_6] : memref<16x128xf32, #tpu.memory_space<vmem>>, vector<16x128xf32>
    tpu.vector_store %arg7[%c0_5, %c0_6], %5 {strides = array<i32>} : memref<16x128xf32, #tpu.memory_space<vmem>>, vector<16x128xf32>,
    %c0_7 = arith.constant 0 : index
    %c0_8 = arith.constant 0 : index
    %7 = vector.load %arg2[%c0_7, %c0_8] : memref<32x128xf32, #tpu.memory_space<vmem>>, vector<32x128xf32>
    %cst_9 = arith.constant 0.000000e+00 : f32
    %8 = vector.broadcast %cst_9 : f32 to vector<2x32xf32>
    %cst_10 = arith.constant 0.000000e+00 : f32
    %9 = vector.broadcast %cst_10 : f32 to vector<2x32xf32>
    %c0_i32 = arith.constant 0 : i32
    %c2_i32 = arith.constant 2 : i32
    %10 = arith.muli %c0_i32, %c2_i32 : i32
    %11 = tpu.assume_multiple %10, 2 : i32
    %12 = arith.index_cast %11 : i32 to index
    %c0_11 = arith.constant 0 : index
    %13 = vector.load %arg7[%12, %c0_11] : memref<16x128xf32, #tpu.memory_space<vmem>>, vector<2x128xf32>
    %cst_12 = arith.constant dense<0.000000e+00> : vector<2x128xf32>
    %14 = tpu.matmul %8, %7, %cst_12 {dimension_numbers = #tpu.dot_dimension_numbers<[1], [0], [0], [1], [0, 0, 1, 1], [], []>} : vector<2x32xf32>, vector<32x128xf32>, vector<2x128xf32> -> vector<2x128xf32>
    %15 = arith.addf %13, %14 : vector<2x128xf32>
    %16 = vector.extract_strided_slice %15 {offsets = [0, 0], sizes = [2, 32], strides = [1, 1]} : vector<2x128xf32> to vector<2x32xf32>
    %17 = arith.negf %16 : vector<2x32xf32>
    %18 = math.exp %17 : vector<2x32xf32>
    %cst_13 = arith.constant 1.000000e+00 : f32
    %19 = vector.broadcast %cst_13 : f32 to vector<2x32xf32>
    %20 = arith.addf %19, %18 : vector<2x32xf32>
    %21 = arith.divf %19, %20 : vector<2x32xf32>
    %22 = vector.extract_strided_slice %15 {offsets = [0, 32], sizes = [2, 32], strides = [1, 1]} : vector<2x128xf32> to vector<2x32xf32>
    %23 = arith.negf %22 : vector<2x32xf32>
    %24 = math.exp %23 : vector<2x32xf32>
    %cst_14 = arith.constant 1.000000e+00 : f32
    %25 = vector.broadcast %cst_14 : f32 to vector<2x32xf32>
    %26 = arith.addf %25, %24 : vector<2x32xf32>
    %27 = arith.divf %25, %26 : vector<2x32xf32>
    %28 = vector.extract_strided_slice %15 {offsets = [0, 64], sizes = [2, 32], strides = [1, 1]} : vector<2x128xf32> to vector<2x32xf32>
    %29 = math.tanh %28 : vector<2x32xf32>
    %30 = vector.extract_strided_slice %15 {offsets = [0, 96], sizes = [2, 32], strides = [1, 1]} : vector<2x128xf32> to vector<2x32xf32>
    %31 = arith.negf %30 : vector<2x32xf32>
    %32 = math.exp %31 : vector<2x32xf32>
    %cst_15 = arith.constant 1.000000e+00 : f32
    %33 = vector.broadcast %cst_15 : f32 to vector<2x32xf32>
    %34 = arith.addf %33, %32 : vector<2x32xf32>
    %35 = arith.divf %33, %34 : vector<2x32xf32>
    %36 = arith.mulf %27, %9 : vector<2x32xf32>
    %37 = arith.mulf %21, %29 : vector<2x32xf32>
    %38 = arith.addf %36, %37 : vector<2x32xf32>
    %39 = math.tanh %38 : vector<2x32xf32>
    %40 = arith.mulf %35, %39 : vector<2x32xf32>
    %41 = arith.index_cast %11 : i32 to index
    %c0_16 = arith.constant 0 : index
    %42 = vector.load %arg6[%41, %c0_16] : memref<16x32xf32, #tpu.memory_space<vmem>>, vector<2x32xf32>
    tpu.vector_store %arg6[%41, %c0_16], %40 {strides = array<i32>} : memref<16x32xf32, #tpu.memory_space<vmem>>, vector<2x32xf32>,
    %c1_i32 = arith.constant 1 : i32
    %c2_i32_17 = arith.constant 2 : i32
    %43 = arith.muli %c1_i32, %c2_i32_17 : i32
    %44 = tpu.assume_multiple %43, 2 : i32
    %45 = arith.index_cast %44 : i32 to index
    %c0_18 = arith.constant 0 : index
    %46 = vector.load %arg7[%45, %c0_18] : memref<16x128xf32, #tpu.memory_space<vmem>>, vector<2x128xf32>
    %cst_19 = arith.constant dense<0.000000e+00> : vector<2x128xf32>
    %47 = tpu.matmul %40, %7, %cst_19 {dimension_numbers = #tpu.dot_dimension_numbers<[1], [0], [0], [1], [0, 0, 1, 1], [], []>} : vector<2x32xf32>, vector<32x128xf32>, vector<2x128xf32> -> vector<2x128xf32>
    %48 = arith.addf %46, %47 : vector<2x128xf32>
    %49 = vector.extract_strided_slice %48 {offsets = [0, 0], sizes = [2, 32], strides = [1, 1]} : vector<2x128xf32> to vector<2x32xf32>
    %50 = arith.negf %49 : vector<2x32xf32>
    %51 = math.exp %50 : vector<2x32xf32>
    %cst_20 = arith.constant 1.000000e+00 : f32
    %52 = vector.broadcast %cst_20 : f32 to vector<2x32xf32>
    %53 = arith.addf %52, %51 : vector<2x32xf32>
    %54 = arith.divf %52, %53 : vector<2x32xf32>
    %55 = vector.extract_strided_slice %48 {offsets = [0, 32], sizes = [2, 32], strides = [1, 1]} : vector<2x128xf32> to vector<2x32xf32>
    %56 = arith.negf %55 : vector<2x32xf32>
    %57 = math.exp %56 : vector<2x32xf32>
    %cst_21 = arith.constant 1.000000e+00 : f32
    %58 = vector.broadcast %cst_21 : f32 to vector<2x32xf32>
    %59 = arith.addf %58, %57 : vector<2x32xf32>
    %60 = arith.divf %58, %59 : vector<2x32xf32>
    %61 = vector.extract_strided_slice %48 {offsets = [0, 64], sizes = [2, 32], strides = [1, 1]} : vector<2x128xf32> to vector<2x32xf32>
    %62 = math.tanh %61 : vector<2x32xf32>
    %63 = vector.extract_strided_slice %48 {offsets = [0, 96], sizes = [2, 32], strides = [1, 1]} : vector<2x128xf32> to vector<2x32xf32>
    %64 = arith.negf %63 : vector<2x32xf32>
    %65 = math.exp %64 : vector<2x32xf32>
    %cst_22 = arith.constant 1.000000e+00 : f32
    %66 = vector.broadcast %cst_22 : f32 to vector<2x32xf32>
    %67 = arith.addf %66, %65 : vector<2x32xf32>
    %68 = arith.divf %66, %67 : vector<2x32xf32>
    %69 = arith.mulf %60, %38 : vector<2x32xf32>
    %70 = arith.mulf %54, %62 : vector<2x32xf32>
    %71 = arith.addf %69, %70 : vector<2x32xf32>
    %72 = math.tanh %71 : vector<2x32xf32>
    %73 = arith.mulf %68, %72 : vector<2x32xf32>
    %74 = arith.index_cast %44 : i32 to index
    %c0_23 = arith.constant 0 : index
    %75 = vector.load %arg6[%74, %c0_23] : memref<16x32xf32, #tpu.memory_space<vmem>>, vector<2x32xf32>
    tpu.vector_store %arg6[%74, %c0_23], %73 {strides = array<i32>} : memref<16x32xf32, #tpu.memory_space<vmem>>, vector<2x32xf32>,
    %c2_i32_24 = arith.constant 2 : i32
    %c2_i32_25 = arith.constant 2 : i32
    %76 = arith.muli %c2_i32_24, %c2_i32_25 : i32
    %77 = tpu.assume_multiple %76, 2 : i32
    %78 = arith.index_cast %77 : i32 to index
    %c0_26 = arith.constant 0 : index
    %79 = vector.load %arg7[%78, %c0_26] : memref<16x128xf32, #tpu.memory_space<vmem>>, vector<2x128xf32>
    %cst_27 = arith.constant dense<0.000000e+00> : vector<2x128xf32>
    %80 = tpu.matmul %73, %7, %cst_27 {dimension_numbers = #tpu.dot_dimension_numbers<[1], [0], [0], [1], [0, 0, 1, 1], [], []>} : vector<2x32xf32>, vector<32x128xf32>, vector<2x128xf32> -> vector<2x128xf32>
    %81 = arith.addf %79, %80 : vector<2x128xf32>
    %82 = vector.extract_strided_slice %81 {offsets = [0, 0], sizes = [2, 32], strides = [1, 1]} : vector<2x128xf32> to vector<2x32xf32>
    %83 = arith.negf %82 : vector<2x32xf32>
    %84 = math.exp %83 : vector<2x32xf32>
    %cst_28 = arith.constant 1.000000e+00 : f32
    %85 = vector.broadcast %cst_28 : f32 to vector<2x32xf32>
    %86 = arith.addf %85, %84 : vector<2x32xf32>
    %87 = arith.divf %85, %86 : vector<2x32xf32>
    %88 = vector.extract_strided_slice %81 {offsets = [0, 32], sizes = [2, 32], strides = [1, 1]} : vector<2x128xf32> to vector<2x32xf32>
    %89 = arith.negf %88 : vector<2x32xf32>
    %90 = math.exp %89 : vector<2x32xf32>
    %cst_29 = arith.constant 1.000000e+00 : f32
    %91 = vector.broadcast %cst_29 : f32 to vector<2x32xf32>
    %92 = arith.addf %91, %90 : vector<2x32xf32>
    %93 = arith.divf %91, %92 : vector<2x32xf32>
    %94 = vector.extract_strided_slice %81 {offsets = [0, 64], sizes = [2, 32], strides = [1, 1]} : vector<2x128xf32> to vector<2x32xf32>
    %95 = math.tanh %94 : vector<2x32xf32>
    %96 = vector.extract_strided_slice %81 {offsets = [0, 96], sizes = [2, 32], strides = [1, 1]} : vector<2x128xf32> to vector<2x32xf32>
    %97 = arith.negf %96 : vector<2x32xf32>
    %98 = math.exp %97 : vector<2x32xf32>
    %cst_30 = arith.constant 1.000000e+00 : f32
    %99 = vector.broadcast %cst_30 : f32 to vector<2x32xf32>
    %100 = arith.addf %99, %98 : vector<2x32xf32>
    %101 = arith.divf %99, %100 : vector<2x32xf32>
    %102 = arith.mulf %93, %71 : vector<2x32xf32>
    %103 = arith.mulf %87, %95 : vector<2x32xf32>
    %104 = arith.addf %102, %103 : vector<2x32xf32>
    %105 = math.tanh %104 : vector<2x32xf32>
    %106 = arith.mulf %101, %105 : vector<2x32xf32>
    %107 = arith.index_cast %77 : i32 to index
    %c0_31 = arith.constant 0 : index
    %108 = vector.load %arg6[%107, %c0_31] : memref<16x32xf32, #tpu.memory_space<vmem>>, vector<2x32xf32>
    tpu.vector_store %arg6[%107, %c0_31], %106 {strides = array<i32>} : memref<16x32xf32, #tpu.memory_space<vmem>>, vector<2x32xf32>,
    %c3_i32 = arith.constant 3 : i32
    %c2_i32_32 = arith.constant 2 : i32
    %109 = arith.muli %c3_i32, %c2_i32_32 : i32
    %110 = tpu.assume_multiple %109, 2 : i32
    %111 = arith.index_cast %110 : i32 to index
    %c0_33 = arith.constant 0 : index
    %112 = vector.load %arg7[%111, %c0_33] : memref<16x128xf32, #tpu.memory_space<vmem>>, vector<2x128xf32>
    %cst_34 = arith.constant dense<0.000000e+00> : vector<2x128xf32>
    %113 = tpu.matmul %106, %7, %cst_34 {dimension_numbers = #tpu.dot_dimension_numbers<[1], [0], [0], [1], [0, 0, 1, 1], [], []>} : vector<2x32xf32>, vector<32x128xf32>, vector<2x128xf32> -> vector<2x128xf32>
    %114 = arith.addf %112, %113 : vector<2x128xf32>
    %115 = vector.extract_strided_slice %114 {offsets = [0, 0], sizes = [2, 32], strides = [1, 1]} : vector<2x128xf32> to vector<2x32xf32>
    %116 = arith.negf %115 : vector<2x32xf32>
    %117 = math.exp %116 : vector<2x32xf32>
    %cst_35 = arith.constant 1.000000e+00 : f32
    %118 = vector.broadcast %cst_35 : f32 to vector<2x32xf32>
    %119 = arith.addf %118, %117 : vector<2x32xf32>
    %120 = arith.divf %118, %119 : vector<2x32xf32>
    %121 = vector.extract_strided_slice %114 {offsets = [0, 32], sizes = [2, 32], strides = [1, 1]} : vector<2x128xf32> to vector<2x32xf32>
    %122 = arith.negf %121 : vector<2x32xf32>
    %123 = math.exp %122 : vector<2x32xf32>
    %cst_36 = arith.constant 1.000000e+00 : f32
    %124 = vector.broadcast %cst_36 : f32 to vector<2x32xf32>
    %125 = arith.addf %124, %123 : vector<2x32xf32>
    %126 = arith.divf %124, %125 : vector<2x32xf32>
    %127 = vector.extract_strided_slice %114 {offsets = [0, 64], sizes = [2, 32], strides = [1, 1]} : vector<2x128xf32> to vector<2x32xf32>
    %128 = math.tanh %127 : vector<2x32xf32>
    %129 = vector.extract_strided_slice %114 {offsets = [0, 96], sizes = [2, 32], strides = [1, 1]} : vector<2x128xf32> to vector<2x32xf32>
    %130 = arith.negf %129 : vector<2x32xf32>
    %131 = math.exp %130 : vector<2x32xf32>
    %cst_37 = arith.constant 1.000000e+00 : f32
    %132 = vector.broadcast %cst_37 : f32 to vector<2x32xf32>
    %133 = arith.addf %132, %131 : vector<2x32xf32>
    %134 = arith.divf %132, %133 : vector<2x32xf32>
    %135 = arith.mulf %126, %104 : vector<2x32xf32>
    %136 = arith.mulf %120, %128 : vector<2x32xf32>
    %137 = arith.addf %135, %136 : vector<2x32xf32>
    %138 = math.tanh %137 : vector<2x32xf32>
    %139 = arith.mulf %134, %138 : vector<2x32xf32>
    %140 = arith.index_cast %110 : i32 to index
    %c0_38 = arith.constant 0 : index
    %141 = vector.load %arg6[%140, %c0_38] : memref<16x32xf32, #tpu.memory_space<vmem>>, vector<2x32xf32>
    tpu.vector_store %arg6[%140, %c0_38], %139 {strides = array<i32>} : memref<16x32xf32, #tpu.memory_space<vmem>>, vector<2x32xf32>,
    %c4_i32 = arith.constant 4 : i32
    %c2_i32_39 = arith.constant 2 : i32
    %142 = arith.muli %c4_i32, %c2_i32_39 : i32
    %143 = tpu.assume_multiple %142, 2 : i32
    %144 = arith.index_cast %143 : i32 to index
    %c0_40 = arith.constant 0 : index
    %145 = vector.load %arg7[%144, %c0_40] : memref<16x128xf32, #tpu.memory_space<vmem>>, vector<2x128xf32>
    %cst_41 = arith.constant dense<0.000000e+00> : vector<2x128xf32>
    %146 = tpu.matmul %139, %7, %cst_41 {dimension_numbers = #tpu.dot_dimension_numbers<[1], [0], [0], [1], [0, 0, 1, 1], [], []>} : vector<2x32xf32>, vector<32x128xf32>, vector<2x128xf32> -> vector<2x128xf32>
    %147 = arith.addf %145, %146 : vector<2x128xf32>
    %148 = vector.extract_strided_slice %147 {offsets = [0, 0], sizes = [2, 32], strides = [1, 1]} : vector<2x128xf32> to vector<2x32xf32>
    %149 = arith.negf %148 : vector<2x32xf32>
    %150 = math.exp %149 : vector<2x32xf32>
    %cst_42 = arith.constant 1.000000e+00 : f32
    %151 = vector.broadcast %cst_42 : f32 to vector<2x32xf32>
    %152 = arith.addf %151, %150 : vector<2x32xf32>
    %153 = arith.divf %151, %152 : vector<2x32xf32>
    %154 = vector.extract_strided_slice %147 {offsets = [0, 32], sizes = [2, 32], strides = [1, 1]} : vector<2x128xf32> to vector<2x32xf32>
    %155 = arith.negf %154 : vector<2x32xf32>
    %156 = math.exp %155 : vector<2x32xf32>
    %cst_43 = arith.constant 1.000000e+00 : f32
    %157 = vector.broadcast %cst_43 : f32 to vector<2x32xf32>
    %158 = arith.addf %157, %156 : vector<2x32xf32>
    %159 = arith.divf %157, %158 : vector<2x32xf32>
    %160 = vector.extract_strided_slice %147 {offsets = [0, 64], sizes = [2, 32], strides = [1, 1]} : vector<2x128xf32> to vector<2x32xf32>
    %161 = math.tanh %160 : vector<2x32xf32>
    %162 = vector.extract_strided_slice %147 {offsets = [0, 96], sizes = [2, 32], strides = [1, 1]} : vector<2x128xf32> to vector<2x32xf32>
    %163 = arith.negf %162 : vector<2x32xf32>
    %164 = math.exp %163 : vector<2x32xf32>
    %cst_44 = arith.constant 1.000000e+00 : f32
    %165 = vector.broadcast %cst_44 : f32 to vector<2x32xf32>
    %166 = arith.addf %165, %164 : vector<2x32xf32>
    %167 = arith.divf %165, %166 : vector<2x32xf32>
    %168 = arith.mulf %159, %137 : vector<2x32xf32>
    %169 = arith.mulf %153, %161 : vector<2x32xf32>
    %170 = arith.addf %168, %169 : vector<2x32xf32>
    %171 = math.tanh %170 : vector<2x32xf32>
    %172 = arith.mulf %167, %171 : vector<2x32xf32>
    %173 = arith.index_cast %143 : i32 to index
    %c0_45 = arith.constant 0 : index
    %174 = vector.load %arg6[%173, %c0_45] : memref<16x32xf32, #tpu.memory_space<vmem>>, vector<2x32xf32>
    tpu.vector_store %arg6[%173, %c0_45], %172 {strides = array<i32>} : memref<16x32xf32, #tpu.memory_space<vmem>>, vector<2x32xf32>,
    %c5_i32 = arith.constant 5 : i32
    %c2_i32_46 = arith.constant 2 : i32
    %175 = arith.muli %c5_i32, %c2_i32_46 : i32
    %176 = tpu.assume_multiple %175, 2 : i32
    %177 = arith.index_cast %176 : i32 to index
    %c0_47 = arith.constant 0 : index
    %178 = vector.load %arg7[%177, %c0_47] : memref<16x128xf32, #tpu.memory_space<vmem>>, vector<2x128xf32>
    %cst_48 = arith.constant dense<0.000000e+00> : vector<2x128xf32>
    %179 = tpu.matmul %172, %7, %cst_48 {dimension_numbers = #tpu.dot_dimension_numbers<[1], [0], [0], [1], [0, 0, 1, 1], [], []>} : vector<2x32xf32>, vector<32x128xf32>, vector<2x128xf32> -> vector<2x128xf32>
    %180 = arith.addf %178, %179 : vector<2x128xf32>
    %181 = vector.extract_strided_slice %180 {offsets = [0, 0], sizes = [2, 32], strides = [1, 1]} : vector<2x128xf32> to vector<2x32xf32>
    %182 = arith.negf %181 : vector<2x32xf32>
    %183 = math.exp %182 : vector<2x32xf32>
    %cst_49 = arith.constant 1.000000e+00 : f32
    %184 = vector.broadcast %cst_49 : f32 to vector<2x32xf32>
    %185 = arith.addf %184, %183 : vector<2x32xf32>
    %186 = arith.divf %184, %185 : vector<2x32xf32>
    %187 = vector.extract_strided_slice %180 {offsets = [0, 32], sizes = [2, 32], strides = [1, 1]} : vector<2x128xf32> to vector<2x32xf32>
    %188 = arith.negf %187 : vector<2x32xf32>
    %189 = math.exp %188 : vector<2x32xf32>
    %cst_50 = arith.constant 1.000000e+00 : f32
    %190 = vector.broadcast %cst_50 : f32 to vector<2x32xf32>
    %191 = arith.addf %190, %189 : vector<2x32xf32>
    %192 = arith.divf %190, %191 : vector<2x32xf32>
    %193 = vector.extract_strided_slice %180 {offsets = [0, 64], sizes = [2, 32], strides = [1, 1]} : vector<2x128xf32> to vector<2x32xf32>
    %194 = math.tanh %193 : vector<2x32xf32>
    %195 = vector.extract_strided_slice %180 {offsets = [0, 96], sizes = [2, 32], strides = [1, 1]} : vector<2x128xf32> to vector<2x32xf32>
    %196 = arith.negf %195 : vector<2x32xf32>
    %197 = math.exp %196 : vector<2x32xf32>
    %cst_51 = arith.constant 1.000000e+00 : f32
    %198 = vector.broadcast %cst_51 : f32 to vector<2x32xf32>
    %199 = arith.addf %198, %197 : vector<2x32xf32>
    %200 = arith.divf %198, %199 : vector<2x32xf32>
    %201 = arith.mulf %192, %170 : vector<2x32xf32>
    %202 = arith.mulf %186, %194 : vector<2x32xf32>
    %203 = arith.addf %201, %202 : vector<2x32xf32>
    %204 = math.tanh %203 : vector<2x32xf32>
    %205 = arith.mulf %200, %204 : vector<2x32xf32>
    %206 = arith.index_cast %176 : i32 to index
    %c0_52 = arith.constant 0 : index
    %207 = vector.load %arg6[%206, %c0_52] : memref<16x32xf32, #tpu.memory_space<vmem>>, vector<2x32xf32>
    tpu.vector_store %arg6[%206, %c0_52], %205 {strides = array<i32>} : memref<16x32xf32, #tpu.memory_space<vmem>>, vector<2x32xf32>,
    %c6_i32 = arith.constant 6 : i32
    %c2_i32_53 = arith.constant 2 : i32
    %208 = arith.muli %c6_i32, %c2_i32_53 : i32
    %209 = tpu.assume_multiple %208, 2 : i32
    %210 = arith.index_cast %209 : i32 to index
    %c0_54 = arith.constant 0 : index
    %211 = vector.load %arg7[%210, %c0_54] : memref<16x128xf32, #tpu.memory_space<vmem>>, vector<2x128xf32>
    %cst_55 = arith.constant dense<0.000000e+00> : vector<2x128xf32>
    %212 = tpu.matmul %205, %7, %cst_55 {dimension_numbers = #tpu.dot_dimension_numbers<[1], [0], [0], [1], [0, 0, 1, 1], [], []>} : vector<2x32xf32>, vector<32x128xf32>, vector<2x128xf32> -> vector<2x128xf32>
    %213 = arith.addf %211, %212 : vector<2x128xf32>
    %214 = vector.extract_strided_slice %213 {offsets = [0, 0], sizes = [2, 32], strides = [1, 1]} : vector<2x128xf32> to vector<2x32xf32>
    %215 = arith.negf %214 : vector<2x32xf32>
    %216 = math.exp %215 : vector<2x32xf32>
    %cst_56 = arith.constant 1.000000e+00 : f32
    %217 = vector.broadcast %cst_56 : f32 to vector<2x32xf32>
    %218 = arith.addf %217, %216 : vector<2x32xf32>
    %219 = arith.divf %217, %218 : vector<2x32xf32>
    %220 = vector.extract_strided_slice %213 {offsets = [0, 32], sizes = [2, 32], strides = [1, 1]} : vector<2x128xf32> to vector<2x32xf32>
    %221 = arith.negf %220 : vector<2x32xf32>
    %222 = math.exp %221 : vector<2x32xf32>
    %cst_57 = arith.constant 1.000000e+00 : f32
    %223 = vector.broadcast %cst_57 : f32 to vector<2x32xf32>
    %224 = arith.addf %223, %222 : vector<2x32xf32>
    %225 = arith.divf %223, %224 : vector<2x32xf32>
    %226 = vector.extract_strided_slice %213 {offsets = [0, 64], sizes = [2, 32], strides = [1, 1]} : vector<2x128xf32> to vector<2x32xf32>
    %227 = math.tanh %226 : vector<2x32xf32>
    %228 = vector.extract_strided_slice %213 {offsets = [0, 96], sizes = [2, 32], strides = [1, 1]} : vector<2x128xf32> to vector<2x32xf32>
    %229 = arith.negf %228 : vector<2x32xf32>
    %230 = math.exp %229 : vector<2x32xf32>
    %cst_58 = arith.constant 1.000000e+00 : f32
    %231 = vector.broadcast %cst_58 : f32 to vector<2x32xf32>
    %232 = arith.addf %231, %230 : vector<2x32xf32>
    %233 = arith.divf %231, %232 : vector<2x32xf32>
    %234 = arith.mulf %225, %203 : vector<2x32xf32>
    %235 = arith.mulf %219, %227 : vector<2x32xf32>
    %236 = arith.addf %234, %235 : vector<2x32xf32>
    %237 = math.tanh %236 : vector<2x32xf32>
    %238 = arith.mulf %233, %237 : vector<2x32xf32>
    %239 = arith.index_cast %209 : i32 to index
    %c0_59 = arith.constant 0 : index
    %240 = vector.load %arg6[%239, %c0_59] : memref<16x32xf32, #tpu.memory_space<vmem>>, vector<2x32xf32>
    tpu.vector_store %arg6[%239, %c0_59], %238 {strides = array<i32>} : memref<16x32xf32, #tpu.memory_space<vmem>>, vector<2x32xf32>,
    %c7_i32 = arith.constant 7 : i32
    %c2_i32_60 = arith.constant 2 : i32
    %241 = arith.muli %c7_i32, %c2_i32_60 : i32
    %242 = tpu.assume_multiple %241, 2 : i32
    %243 = arith.index_cast %242 : i32 to index
    %c0_61 = arith.constant 0 : index
    %244 = vector.load %arg7[%243, %c0_61] : memref<16x128xf32, #tpu.memory_space<vmem>>, vector<2x128xf32>
    %cst_62 = arith.constant dense<0.000000e+00> : vector<2x128xf32>
    %245 = tpu.matmul %238, %7, %cst_62 {dimension_numbers = #tpu.dot_dimension_numbers<[1], [0], [0], [1], [0, 0, 1, 1], [], []>} : vector<2x32xf32>, vector<32x128xf32>, vector<2x128xf32> -> vector<2x128xf32>
    %246 = arith.addf %244, %245 : vector<2x128xf32>
    %247 = vector.extract_strided_slice %246 {offsets = [0, 0], sizes = [2, 32], strides = [1, 1]} : vector<2x128xf32> to vector<2x32xf32>
    %248 = arith.negf %247 : vector<2x32xf32>
    %249 = math.exp %248 : vector<2x32xf32>
    %cst_63 = arith.constant 1.000000e+00 : f32
    %250 = vector.broadcast %cst_63 : f32 to vector<2x32xf32>
    %251 = arith.addf %250, %249 : vector<2x32xf32>
    %252 = arith.divf %250, %251 : vector<2x32xf32>
    %253 = vector.extract_strided_slice %246 {offsets = [0, 32], sizes = [2, 32], strides = [1, 1]} : vector<2x128xf32> to vector<2x32xf32>
    %254 = arith.negf %253 : vector<2x32xf32>
    %255 = math.exp %254 : vector<2x32xf32>
    %cst_64 = arith.constant 1.000000e+00 : f32
    %256 = vector.broadcast %cst_64 : f32 to vector<2x32xf32>
    %257 = arith.addf %256, %255 : vector<2x32xf32>
    %258 = arith.divf %256, %257 : vector<2x32xf32>
    %259 = vector.extract_strided_slice %246 {offsets = [0, 64], sizes = [2, 32], strides = [1, 1]} : vector<2x128xf32> to vector<2x32xf32>
    %260 = math.tanh %259 : vector<2x32xf32>
    %261 = vector.extract_strided_slice %246 {offsets = [0, 96], sizes = [2, 32], strides = [1, 1]} : vector<2x128xf32> to vector<2x32xf32>
    %262 = arith.negf %261 : vector<2x32xf32>
    %263 = math.exp %262 : vector<2x32xf32>
    %cst_65 = arith.constant 1.000000e+00 : f32
    %264 = vector.broadcast %cst_65 : f32 to vector<2x32xf32>
    %265 = arith.addf %264, %263 : vector<2x32xf32>
    %266 = arith.divf %264, %265 : vector<2x32xf32>
    %267 = arith.mulf %258, %236 : vector<2x32xf32>
    %268 = arith.mulf %252, %260 : vector<2x32xf32>
    %269 = arith.addf %267, %268 : vector<2x32xf32>
    %270 = math.tanh %269 : vector<2x32xf32>
    %271 = arith.mulf %266, %270 : vector<2x32xf32>
    %272 = arith.index_cast %242 : i32 to index
    %c0_66 = arith.constant 0 : index
    %273 = vector.load %arg6[%272, %c0_66] : memref<16x32xf32, #tpu.memory_space<vmem>>, vector<2x32xf32>
    tpu.vector_store %arg6[%272, %c0_66], %271 {strides = array<i32>} : memref<16x32xf32, #tpu.memory_space<vmem>>, vector<2x32xf32>,
    %c8_i32 = arith.constant 8 : i32
    %c0_67 = arith.constant 0 : index
    %c0_68 = arith.constant 0 : index
    %274 = vector.load %arg6[%c0_67, %c0_68] : memref<16x32xf32, #tpu.memory_space<vmem>>, vector<16x32xf32>
    %cst_69 = arith.constant dense<0.000000e+00> : vector<32xf32>
    %275 = vector.multi_reduction <add>, %274, %cst_69 [0] : vector<16x32xf32> to vector<32xf32>
    %276 = vector.shape_cast %275 : vector<32xf32> to vector<1x32xf32>
    %cst_70 = arith.constant 6.250000e-02 : f32
    %277 = vector.broadcast %cst_70 : f32 to vector<1x32xf32>
    %278 = arith.mulf %276, %277 : vector<1x32xf32>
    %279 = vector.broadcast %278 : vector<1x32xf32> to vector<16x32xf32>
    %280 = arith.subf %274, %279 : vector<16x32xf32>
    %281 = arith.mulf %280, %280 : vector<16x32xf32>
    %cst_71 = arith.constant dense<0.000000e+00> : vector<32xf32>
    %282 = vector.multi_reduction <add>, %281, %cst_71 [0] : vector<16x32xf32> to vector<32xf32>
    %283 = vector.shape_cast %282 : vector<32xf32> to vector<1x32xf32>
    %cst_72 = arith.constant 6.250000e-02 : f32
    %284 = vector.broadcast %cst_72 : f32 to vector<1x32xf32>
    %285 = arith.mulf %283, %284 : vector<1x32xf32>
    %cst_73 = arith.constant 9.99999974E-6 : f32
    %286 = vector.broadcast %cst_73 : f32 to vector<1x32xf32>
    %287 = arith.addf %285, %286 : vector<1x32xf32>
    %288 = math.rsqrt %287 : vector<1x32xf32>
    %289 = vector.broadcast %288 : vector<1x32xf32> to vector<16x32xf32>
    %290 = arith.mulf %280, %289 : vector<16x32xf32>
    %c0_74 = arith.constant 0 : index
    %c0_75 = arith.constant 0 : index
    %291 = vector.load %arg4[%c0_74, %c0_75] : memref<1x32xf32, #tpu.memory_space<vmem>>, vector<1x32xf32>
    %292 = vector.broadcast %291 : vector<1x32xf32> to vector<16x32xf32>
    %293 = arith.mulf %290, %292 : vector<16x32xf32>
    %c0_76 = arith.constant 0 : index
    %c0_77 = arith.constant 0 : index
    %294 = vector.load %arg5[%c0_76, %c0_77] : memref<1x32xf32, #tpu.memory_space<vmem>>, vector<1x32xf32>
    %295 = vector.broadcast %294 : vector<1x32xf32> to vector<16x32xf32>
    %296 = arith.addf %293, %295 : vector<16x32xf32>
    %c0_78 = arith.constant 0 : index
    %c0_79 = arith.constant 0 : index
    %297 = vector.load %arg6[%c0_78, %c0_79] : memref<16x32xf32, #tpu.memory_space<vmem>>, vector<16x32xf32>
    tpu.vector_store %arg6[%c0_78, %c0_79], %296 {strides = array<i32>} : memref<16x32xf32, #tpu.memory_space<vmem>>, vector<16x32xf32>,
    return
  }
}

module attributes {stable_mosaic.version = 11 : i64} {
  func.func @_lstm_bn_kernel(%arg0: memref<16x16xf32, #tpu.memory_space<vmem>>, %arg1: memref<16x128xf32, #tpu.memory_space<vmem>>, %arg2: memref<32x128xf32, #tpu.memory_space<vmem>>, %arg3: memref<1x128xf32, #tpu.memory_space<vmem>>, %arg4: memref<1x32xf32, #tpu.memory_space<vmem>>, %arg5: memref<1x32xf32, #tpu.memory_space<vmem>>, %arg6: memref<16x32xf32, #tpu.memory_space<vmem>>, %arg7: memref<16x128xf32, #tpu.memory_space<vmem>>) attributes {dimension_semantics = [], scalar_prefetch = 0 : i64, scratch_operands = 1 : i64, tpu.core_type = #tpu.core_type<tc>} {
    %c0 = arith.constant 0 : index
    %c0_0 = arith.constant 0 : index
    %0 = vector.load %arg0[%c0, %c0_0] : memref<16x16xf32, #tpu.memory_space<vmem>>, vector<16x16xf32>
    %c0_1 = arith.constant 0 : index
    %c0_2 = arith.constant 0 : index
    %1 = vector.load %arg1[%c0_1, %c0_2] : memref<16x128xf32, #tpu.memory_space<vmem>>, vector<16x128xf32>
    %cst = arith.constant dense<0.000000e+00> : vector<16x128xf32>
    %2 = tpu.matmul %0, %1, %cst {dimension_numbers = #tpu.dot_dimension_numbers<[1], [0], [0], [1], [0, 0, 1, 1], [], []>} : vector<16x16xf32>, vector<16x128xf32>, vector<16x128xf32> -> vector<16x128xf32>
    %c0_3 = arith.constant 0 : index
    %c0_4 = arith.constant 0 : index
    %3 = vector.load %arg3[%c0_3, %c0_4] : memref<1x128xf32, #tpu.memory_space<vmem>>, vector<1x128xf32>
    %4 = vector.broadcast %3 : vector<1x128xf32> to vector<16x128xf32>
    %5 = arith.addf %2, %4 : vector<16x128xf32>
    %c0_5 = arith.constant 0 : index
    %c0_6 = arith.constant 0 : index
    %6 = vector.load %arg7[%c0_5, %c0_6] : memref<16x128xf32, #tpu.memory_space<vmem>>, vector<16x128xf32>
    tpu.vector_store %arg7[%c0_5, %c0_6], %5 {strides = array<i32>} : memref<16x128xf32, #tpu.memory_space<vmem>>, vector<16x128xf32>,
    %c0_7 = arith.constant 0 : index
    %c0_8 = arith.constant 0 : index
    %7 = vector.load %arg2[%c0_7, %c0_8] : memref<32x128xf32, #tpu.memory_space<vmem>>, vector<32x128xf32>
    %cst_9 = arith.constant 0.000000e+00 : f32
    %8 = vector.broadcast %cst_9 : f32 to vector<2x32xf32>
    %cst_10 = arith.constant 0.000000e+00 : f32
    %9 = vector.broadcast %cst_10 : f32 to vector<2x32xf32>
    %c0_i32 = arith.constant 0 : i32
    %c2_i32 = arith.constant 2 : i32
    %10 = arith.muli %c0_i32, %c2_i32 : i32
    %11 = tpu.assume_multiple %10, 2 : i32
    %12 = arith.index_cast %11 : i32 to index
    %c0_11 = arith.constant 0 : index
    %13 = vector.load %arg7[%12, %c0_11] : memref<16x128xf32, #tpu.memory_space<vmem>>, vector<2x128xf32>
    %cst_12 = arith.constant dense<0.000000e+00> : vector<2x128xf32>
    %14 = tpu.matmul %8, %7, %cst_12 {dimension_numbers = #tpu.dot_dimension_numbers<[1], [0], [0], [1], [0, 0, 1, 1], [], []>} : vector<2x32xf32>, vector<32x128xf32>, vector<2x128xf32> -> vector<2x128xf32>
    %15 = arith.addf %13, %14 : vector<2x128xf32>
    %16 = vector.extract_strided_slice %15 {offsets = [0, 0], sizes = [2, 32], strides = [1, 1]} : vector<2x128xf32> to vector<2x32xf32>
    %17 = arith.negf %16 : vector<2x32xf32>
    %18 = math.exp %17 : vector<2x32xf32>
    %cst_13 = arith.constant 1.000000e+00 : f32
    %19 = vector.broadcast %cst_13 : f32 to vector<2x32xf32>
    %20 = arith.addf %19, %18 : vector<2x32xf32>
    %21 = arith.divf %19, %20 : vector<2x32xf32>
    %22 = vector.extract_strided_slice %15 {offsets = [0, 32], sizes = [2, 32], strides = [1, 1]} : vector<2x128xf32> to vector<2x32xf32>
    %23 = arith.negf %22 : vector<2x32xf32>
    %24 = math.exp %23 : vector<2x32xf32>
    %cst_14 = arith.constant 1.000000e+00 : f32
    %25 = vector.broadcast %cst_14 : f32 to vector<2x32xf32>
    %26 = arith.addf %25, %24 : vector<2x32xf32>
    %27 = arith.divf %25, %26 : vector<2x32xf32>
    %28 = vector.extract_strided_slice %15 {offsets = [0, 64], sizes = [2, 32], strides = [1, 1]} : vector<2x128xf32> to vector<2x32xf32>
    %29 = math.tanh %28 : vector<2x32xf32>
    %30 = vector.extract_strided_slice %15 {offsets = [0, 96], sizes = [2, 32], strides = [1, 1]} : vector<2x128xf32> to vector<2x32xf32>
    %31 = arith.negf %30 : vector<2x32xf32>
    %32 = math.exp %31 : vector<2x32xf32>
    %cst_15 = arith.constant 1.000000e+00 : f32
    %33 = vector.broadcast %cst_15 : f32 to vector<2x32xf32>
    %34 = arith.addf %33, %32 : vector<2x32xf32>
    %35 = arith.divf %33, %34 : vector<2x32xf32>
    %36 = arith.mulf %27, %9 : vector<2x32xf32>
    %37 = arith.mulf %21, %29 : vector<2x32xf32>
    %38 = arith.addf %36, %37 : vector<2x32xf32>
    %39 = math.tanh %38 : vector<2x32xf32>
    %40 = arith.mulf %35, %39 : vector<2x32xf32>
    %41 = arith.index_cast %11 : i32 to index
    %c0_16 = arith.constant 0 : index
    %42 = vector.load %arg6[%41, %c0_16] : memref<16x32xf32, #tpu.memory_space<vmem>>, vector<2x32xf32>
    tpu.vector_store %arg6[%41, %c0_16], %40 {strides = array<i32>} : memref<16x32xf32, #tpu.memory_space<vmem>>, vector<2x32xf32>,
    %c1_i32 = arith.constant 1 : i32
    %c2_i32_17 = arith.constant 2 : i32
    %43 = arith.muli %c1_i32, %c2_i32_17 : i32
    %44 = tpu.assume_multiple %43, 2 : i32
    %45 = arith.index_cast %44 : i32 to index
    %c0_18 = arith.constant 0 : index
    %46 = vector.load %arg7[%45, %c0_18] : memref<16x128xf32, #tpu.memory_space<vmem>>, vector<2x128xf32>
    %cst_19 = arith.constant dense<0.000000e+00> : vector<2x128xf32>
    %47 = tpu.matmul %40, %7, %cst_19 {dimension_numbers = #tpu.dot_dimension_numbers<[1], [0], [0], [1], [0, 0, 1, 1], [], []>} : vector<2x32xf32>, vector<32x128xf32>, vector<2x128xf32> -> vector<2x128xf32>
    %48 = arith.addf %46, %47 : vector<2x128xf32>
    %49 = vector.extract_strided_slice %48 {offsets = [0, 0], sizes = [2, 32], strides = [1, 1]} : vector<2x128xf32> to vector<2x32xf32>
    %50 = arith.negf %49 : vector<2x32xf32>
    %51 = math.exp %50 : vector<2x32xf32>
    %cst_20 = arith.constant 1.000000e+00 : f32
    %52 = vector.broadcast %cst_20 : f32 to vector<2x32xf32>
    %53 = arith.addf %52, %51 : vector<2x32xf32>
    %54 = arith.divf %52, %53 : vector<2x32xf32>
    %55 = vector.extract_strided_slice %48 {offsets = [0, 32], sizes = [2, 32], strides = [1, 1]} : vector<2x128xf32> to vector<2x32xf32>
    %56 = arith.negf %55 : vector<2x32xf32>
    %57 = math.exp %56 : vector<2x32xf32>
    %cst_21 = arith.constant 1.000000e+00 : f32
    %58 = vector.broadcast %cst_21 : f32 to vector<2x32xf32>
    %59 = arith.addf %58, %57 : vector<2x32xf32>
    %60 = arith.divf %58, %59 : vector<2x32xf32>
    %61 = vector.extract_strided_slice %48 {offsets = [0, 64], sizes = [2, 32], strides = [1, 1]} : vector<2x128xf32> to vector<2x32xf32>
    %62 = math.tanh %61 : vector<2x32xf32>
    %63 = vector.extract_strided_slice %48 {offsets = [0, 96], sizes = [2, 32], strides = [1, 1]} : vector<2x128xf32> to vector<2x32xf32>
    %64 = arith.negf %63 : vector<2x32xf32>
    %65 = math.exp %64 : vector<2x32xf32>
    %cst_22 = arith.constant 1.000000e+00 : f32
    %66 = vector.broadcast %cst_22 : f32 to vector<2x32xf32>
    %67 = arith.addf %66, %65 : vector<2x32xf32>
    %68 = arith.divf %66, %67 : vector<2x32xf32>
    %69 = arith.mulf %60, %38 : vector<2x32xf32>
    %70 = arith.mulf %54, %62 : vector<2x32xf32>
    %71 = arith.addf %69, %70 : vector<2x32xf32>
    %72 = math.tanh %71 : vector<2x32xf32>
    %73 = arith.mulf %68, %72 : vector<2x32xf32>
    %74 = arith.index_cast %44 : i32 to index
    %c0_23 = arith.constant 0 : index
    %75 = vector.load %arg6[%74, %c0_23] : memref<16x32xf32, #tpu.memory_space<vmem>>, vector<2x32xf32>
    tpu.vector_store %arg6[%74, %c0_23], %73 {strides = array<i32>} : memref<16x32xf32, #tpu.memory_space<vmem>>, vector<2x32xf32>,
    %c2_i32_24 = arith.constant 2 : i32
    %c2_i32_25 = arith.constant 2 : i32
    %76 = arith.muli %c2_i32_24, %c2_i32_25 : i32
    %77 = tpu.assume_multiple %76, 2 : i32
    %78 = arith.index_cast %77 : i32 to index
    %c0_26 = arith.constant 0 : index
    %79 = vector.load %arg7[%78, %c0_26] : memref<16x128xf32, #tpu.memory_space<vmem>>, vector<2x128xf32>
    %cst_27 = arith.constant dense<0.000000e+00> : vector<2x128xf32>
    %80 = tpu.matmul %73, %7, %cst_27 {dimension_numbers = #tpu.dot_dimension_numbers<[1], [0], [0], [1], [0, 0, 1, 1], [], []>} : vector<2x32xf32>, vector<32x128xf32>, vector<2x128xf32> -> vector<2x128xf32>
    %81 = arith.addf %79, %80 : vector<2x128xf32>
    %82 = vector.extract_strided_slice %81 {offsets = [0, 0], sizes = [2, 32], strides = [1, 1]} : vector<2x128xf32> to vector<2x32xf32>
    %83 = arith.negf %82 : vector<2x32xf32>
    %84 = math.exp %83 : vector<2x32xf32>
    %cst_28 = arith.constant 1.000000e+00 : f32
    %85 = vector.broadcast %cst_28 : f32 to vector<2x32xf32>
    %86 = arith.addf %85, %84 : vector<2x32xf32>
    %87 = arith.divf %85, %86 : vector<2x32xf32>
    %88 = vector.extract_strided_slice %81 {offsets = [0, 32], sizes = [2, 32], strides = [1, 1]} : vector<2x128xf32> to vector<2x32xf32>
    %89 = arith.negf %88 : vector<2x32xf32>
    %90 = math.exp %89 : vector<2x32xf32>
    %cst_29 = arith.constant 1.000000e+00 : f32
    %91 = vector.broadcast %cst_29 : f32 to vector<2x32xf32>
    %92 = arith.addf %91, %90 : vector<2x32xf32>
    %93 = arith.divf %91, %92 : vector<2x32xf32>
    %94 = vector.extract_strided_slice %81 {offsets = [0, 64], sizes = [2, 32], strides = [1, 1]} : vector<2x128xf32> to vector<2x32xf32>
    %95 = math.tanh %94 : vector<2x32xf32>
    %96 = vector.extract_strided_slice %81 {offsets = [0, 96], sizes = [2, 32], strides = [1, 1]} : vector<2x128xf32> to vector<2x32xf32>
    %97 = arith.negf %96 : vector<2x32xf32>
    %98 = math.exp %97 : vector<2x32xf32>
    %cst_30 = arith.constant 1.000000e+00 : f32
    %99 = vector.broadcast %cst_30 : f32 to vector<2x32xf32>
    %100 = arith.addf %99, %98 : vector<2x32xf32>
    %101 = arith.divf %99, %100 : vector<2x32xf32>
    %102 = arith.mulf %93, %71 : vector<2x32xf32>
    %103 = arith.mulf %87, %95 : vector<2x32xf32>
    %104 = arith.addf %102, %103 : vector<2x32xf32>
    %105 = math.tanh %104 : vector<2x32xf32>
    %106 = arith.mulf %101, %105 : vector<2x32xf32>
    %107 = arith.index_cast %77 : i32 to index
    %c0_31 = arith.constant 0 : index
    %108 = vector.load %arg6[%107, %c0_31] : memref<16x32xf32, #tpu.memory_space<vmem>>, vector<2x32xf32>
    tpu.vector_store %arg6[%107, %c0_31], %106 {strides = array<i32>} : memref<16x32xf32, #tpu.memory_space<vmem>>, vector<2x32xf32>,
    %c3_i32 = arith.constant 3 : i32
    %c2_i32_32 = arith.constant 2 : i32
    %109 = arith.muli %c3_i32, %c2_i32_32 : i32
    %110 = tpu.assume_multiple %109, 2 : i32
    %111 = arith.index_cast %110 : i32 to index
    %c0_33 = arith.constant 0 : index
    %112 = vector.load %arg7[%111, %c0_33] : memref<16x128xf32, #tpu.memory_space<vmem>>, vector<2x128xf32>
    %cst_34 = arith.constant dense<0.000000e+00> : vector<2x128xf32>
    %113 = tpu.matmul %106, %7, %cst_34 {dimension_numbers = #tpu.dot_dimension_numbers<[1], [0], [0], [1], [0, 0, 1, 1], [], []>} : vector<2x32xf32>, vector<32x128xf32>, vector<2x128xf32> -> vector<2x128xf32>
    %114 = arith.addf %112, %113 : vector<2x128xf32>
    %115 = vector.extract_strided_slice %114 {offsets = [0, 0], sizes = [2, 32], strides = [1, 1]} : vector<2x128xf32> to vector<2x32xf32>
    %116 = arith.negf %115 : vector<2x32xf32>
    %117 = math.exp %116 : vector<2x32xf32>
    %cst_35 = arith.constant 1.000000e+00 : f32
    %118 = vector.broadcast %cst_35 : f32 to vector<2x32xf32>
    %119 = arith.addf %118, %117 : vector<2x32xf32>
    %120 = arith.divf %118, %119 : vector<2x32xf32>
    %121 = vector.extract_strided_slice %114 {offsets = [0, 32], sizes = [2, 32], strides = [1, 1]} : vector<2x128xf32> to vector<2x32xf32>
    %122 = arith.negf %121 : vector<2x32xf32>
    %123 = math.exp %122 : vector<2x32xf32>
    %cst_36 = arith.constant 1.000000e+00 : f32
    %124 = vector.broadcast %cst_36 : f32 to vector<2x32xf32>
    %125 = arith.addf %124, %123 : vector<2x32xf32>
    %126 = arith.divf %124, %125 : vector<2x32xf32>
    %127 = vector.extract_strided_slice %114 {offsets = [0, 64], sizes = [2, 32], strides = [1, 1]} : vector<2x128xf32> to vector<2x32xf32>
    %128 = math.tanh %127 : vector<2x32xf32>
    %129 = vector.extract_strided_slice %114 {offsets = [0, 96], sizes = [2, 32], strides = [1, 1]} : vector<2x128xf32> to vector<2x32xf32>
    %130 = arith.negf %129 : vector<2x32xf32>
    %131 = math.exp %130 : vector<2x32xf32>
    %cst_37 = arith.constant 1.000000e+00 : f32
    %132 = vector.broadcast %cst_37 : f32 to vector<2x32xf32>
    %133 = arith.addf %132, %131 : vector<2x32xf32>
    %134 = arith.divf %132, %133 : vector<2x32xf32>
    %135 = arith.mulf %126, %104 : vector<2x32xf32>
    %136 = arith.mulf %120, %128 : vector<2x32xf32>
    %137 = arith.addf %135, %136 : vector<2x32xf32>
    %138 = math.tanh %137 : vector<2x32xf32>
    %139 = arith.mulf %134, %138 : vector<2x32xf32>
    %140 = arith.index_cast %110 : i32 to index
    %c0_38 = arith.constant 0 : index
    %141 = vector.load %arg6[%140, %c0_38] : memref<16x32xf32, #tpu.memory_space<vmem>>, vector<2x32xf32>
    tpu.vector_store %arg6[%140, %c0_38], %139 {strides = array<i32>} : memref<16x32xf32, #tpu.memory_space<vmem>>, vector<2x32xf32>,
    %c4_i32 = arith.constant 4 : i32
    %c2_i32_39 = arith.constant 2 : i32
    %142 = arith.muli %c4_i32, %c2_i32_39 : i32
    %143 = tpu.assume_multiple %142, 2 : i32
    %144 = arith.index_cast %143 : i32 to index
    %c0_40 = arith.constant 0 : index
    %145 = vector.load %arg7[%144, %c0_40] : memref<16x128xf32, #tpu.memory_space<vmem>>, vector<2x128xf32>
    %cst_41 = arith.constant dense<0.000000e+00> : vector<2x128xf32>
    %146 = tpu.matmul %139, %7, %cst_41 {dimension_numbers = #tpu.dot_dimension_numbers<[1], [0], [0], [1], [0, 0, 1, 1], [], []>} : vector<2x32xf32>, vector<32x128xf32>, vector<2x128xf32> -> vector<2x128xf32>
    %147 = arith.addf %145, %146 : vector<2x128xf32>
    %148 = vector.extract_strided_slice %147 {offsets = [0, 0], sizes = [2, 32], strides = [1, 1]} : vector<2x128xf32> to vector<2x32xf32>
    %149 = arith.negf %148 : vector<2x32xf32>
    %150 = math.exp %149 : vector<2x32xf32>
    %cst_42 = arith.constant 1.000000e+00 : f32
    %151 = vector.broadcast %cst_42 : f32 to vector<2x32xf32>
    %152 = arith.addf %151, %150 : vector<2x32xf32>
    %153 = arith.divf %151, %152 : vector<2x32xf32>
    %154 = vector.extract_strided_slice %147 {offsets = [0, 32], sizes = [2, 32], strides = [1, 1]} : vector<2x128xf32> to vector<2x32xf32>
    %155 = arith.negf %154 : vector<2x32xf32>
    %156 = math.exp %155 : vector<2x32xf32>
    %cst_43 = arith.constant 1.000000e+00 : f32
    %157 = vector.broadcast %cst_43 : f32 to vector<2x32xf32>
    %158 = arith.addf %157, %156 : vector<2x32xf32>
    %159 = arith.divf %157, %158 : vector<2x32xf32>
    %160 = vector.extract_strided_slice %147 {offsets = [0, 64], sizes = [2, 32], strides = [1, 1]} : vector<2x128xf32> to vector<2x32xf32>
    %161 = math.tanh %160 : vector<2x32xf32>
    %162 = vector.extract_strided_slice %147 {offsets = [0, 96], sizes = [2, 32], strides = [1, 1]} : vector<2x128xf32> to vector<2x32xf32>
    %163 = arith.negf %162 : vector<2x32xf32>
    %164 = math.exp %163 : vector<2x32xf32>
    %cst_44 = arith.constant 1.000000e+00 : f32
    %165 = vector.broadcast %cst_44 : f32 to vector<2x32xf32>
    %166 = arith.addf %165, %164 : vector<2x32xf32>
    %167 = arith.divf %165, %166 : vector<2x32xf32>
    %168 = arith.mulf %159, %137 : vector<2x32xf32>
    %169 = arith.mulf %153, %161 : vector<2x32xf32>
    %170 = arith.addf %168, %169 : vector<2x32xf32>
    %171 = math.tanh %170 : vector<2x32xf32>
    %172 = arith.mulf %167, %171 : vector<2x32xf32>
    %173 = arith.index_cast %143 : i32 to index
    %c0_45 = arith.constant 0 : index
    %174 = vector.load %arg6[%173, %c0_45] : memref<16x32xf32, #tpu.memory_space<vmem>>, vector<2x32xf32>
    tpu.vector_store %arg6[%173, %c0_45], %172 {strides = array<i32>} : memref<16x32xf32, #tpu.memory_space<vmem>>, vector<2x32xf32>,
    %c5_i32 = arith.constant 5 : i32
    %c2_i32_46 = arith.constant 2 : i32
    %175 = arith.muli %c5_i32, %c2_i32_46 : i32
    %176 = tpu.assume_multiple %175, 2 : i32
    %177 = arith.index_cast %176 : i32 to index
    %c0_47 = arith.constant 0 : index
    %178 = vector.load %arg7[%177, %c0_47] : memref<16x128xf32, #tpu.memory_space<vmem>>, vector<2x128xf32>
    %cst_48 = arith.constant dense<0.000000e+00> : vector<2x128xf32>
    %179 = tpu.matmul %172, %7, %cst_48 {dimension_numbers = #tpu.dot_dimension_numbers<[1], [0], [0], [1], [0, 0, 1, 1], [], []>} : vector<2x32xf32>, vector<32x128xf32>, vector<2x128xf32> -> vector<2x128xf32>
    %180 = arith.addf %178, %179 : vector<2x128xf32>
    %181 = vector.extract_strided_slice %180 {offsets = [0, 0], sizes = [2, 32], strides = [1, 1]} : vector<2x128xf32> to vector<2x32xf32>
    %182 = arith.negf %181 : vector<2x32xf32>
    %183 = math.exp %182 : vector<2x32xf32>
    %cst_49 = arith.constant 1.000000e+00 : f32
    %184 = vector.broadcast %cst_49 : f32 to vector<2x32xf32>
    %185 = arith.addf %184, %183 : vector<2x32xf32>
    %186 = arith.divf %184, %185 : vector<2x32xf32>
    %187 = vector.extract_strided_slice %180 {offsets = [0, 32], sizes = [2, 32], strides = [1, 1]} : vector<2x128xf32> to vector<2x32xf32>
    %188 = arith.negf %187 : vector<2x32xf32>
    %189 = math.exp %188 : vector<2x32xf32>
    %cst_50 = arith.constant 1.000000e+00 : f32
    %190 = vector.broadcast %cst_50 : f32 to vector<2x32xf32>
    %191 = arith.addf %190, %189 : vector<2x32xf32>
    %192 = arith.divf %190, %191 : vector<2x32xf32>
    %193 = vector.extract_strided_slice %180 {offsets = [0, 64], sizes = [2, 32], strides = [1, 1]} : vector<2x128xf32> to vector<2x32xf32>
    %194 = math.tanh %193 : vector<2x32xf32>
    %195 = vector.extract_strided_slice %180 {offsets = [0, 96], sizes = [2, 32], strides = [1, 1]} : vector<2x128xf32> to vector<2x32xf32>
    %196 = arith.negf %195 : vector<2x32xf32>
    %197 = math.exp %196 : vector<2x32xf32>
    %cst_51 = arith.constant 1.000000e+00 : f32
    %198 = vector.broadcast %cst_51 : f32 to vector<2x32xf32>
    %199 = arith.addf %198, %197 : vector<2x32xf32>
    %200 = arith.divf %198, %199 : vector<2x32xf32>
    %201 = arith.mulf %192, %170 : vector<2x32xf32>
    %202 = arith.mulf %186, %194 : vector<2x32xf32>
    %203 = arith.addf %201, %202 : vector<2x32xf32>
    %204 = math.tanh %203 : vector<2x32xf32>
    %205 = arith.mulf %200, %204 : vector<2x32xf32>
    %206 = arith.index_cast %176 : i32 to index
    %c0_52 = arith.constant 0 : index
    %207 = vector.load %arg6[%206, %c0_52] : memref<16x32xf32, #tpu.memory_space<vmem>>, vector<2x32xf32>
    tpu.vector_store %arg6[%206, %c0_52], %205 {strides = array<i32>} : memref<16x32xf32, #tpu.memory_space<vmem>>, vector<2x32xf32>,
    %c6_i32 = arith.constant 6 : i32
    %c2_i32_53 = arith.constant 2 : i32
    %208 = arith.muli %c6_i32, %c2_i32_53 : i32
    %209 = tpu.assume_multiple %208, 2 : i32
    %210 = arith.index_cast %209 : i32 to index
    %c0_54 = arith.constant 0 : index
    %211 = vector.load %arg7[%210, %c0_54] : memref<16x128xf32, #tpu.memory_space<vmem>>, vector<2x128xf32>
    %cst_55 = arith.constant dense<0.000000e+00> : vector<2x128xf32>
    %212 = tpu.matmul %205, %7, %cst_55 {dimension_numbers = #tpu.dot_dimension_numbers<[1], [0], [0], [1], [0, 0, 1, 1], [], []>} : vector<2x32xf32>, vector<32x128xf32>, vector<2x128xf32> -> vector<2x128xf32>
    %213 = arith.addf %211, %212 : vector<2x128xf32>
    %214 = vector.extract_strided_slice %213 {offsets = [0, 0], sizes = [2, 32], strides = [1, 1]} : vector<2x128xf32> to vector<2x32xf32>
    %215 = arith.negf %214 : vector<2x32xf32>
    %216 = math.exp %215 : vector<2x32xf32>
    %cst_56 = arith.constant 1.000000e+00 : f32
    %217 = vector.broadcast %cst_56 : f32 to vector<2x32xf32>
    %218 = arith.addf %217, %216 : vector<2x32xf32>
    %219 = arith.divf %217, %218 : vector<2x32xf32>
    %220 = vector.extract_strided_slice %213 {offsets = [0, 32], sizes = [2, 32], strides = [1, 1]} : vector<2x128xf32> to vector<2x32xf32>
    %221 = arith.negf %220 : vector<2x32xf32>
    %222 = math.exp %221 : vector<2x32xf32>
    %cst_57 = arith.constant 1.000000e+00 : f32
    %223 = vector.broadcast %cst_57 : f32 to vector<2x32xf32>
    %224 = arith.addf %223, %222 : vector<2x32xf32>
    %225 = arith.divf %223, %224 : vector<2x32xf32>
    %226 = vector.extract_strided_slice %213 {offsets = [0, 64], sizes = [2, 32], strides = [1, 1]} : vector<2x128xf32> to vector<2x32xf32>
    %227 = math.tanh %226 : vector<2x32xf32>
    %228 = vector.extract_strided_slice %213 {offsets = [0, 96], sizes = [2, 32], strides = [1, 1]} : vector<2x128xf32> to vector<2x32xf32>
    %229 = arith.negf %228 : vector<2x32xf32>
    %230 = math.exp %229 : vector<2x32xf32>
    %cst_58 = arith.constant 1.000000e+00 : f32
    %231 = vector.broadcast %cst_58 : f32 to vector<2x32xf32>
    %232 = arith.addf %231, %230 : vector<2x32xf32>
    %233 = arith.divf %231, %232 : vector<2x32xf32>
    %234 = arith.mulf %225, %203 : vector<2x32xf32>
    %235 = arith.mulf %219, %227 : vector<2x32xf32>
    %236 = arith.addf %234, %235 : vector<2x32xf32>
    %237 = math.tanh %236 : vector<2x32xf32>
    %238 = arith.mulf %233, %237 : vector<2x32xf32>
    %239 = arith.index_cast %209 : i32 to index
    %c0_59 = arith.constant 0 : index
    %240 = vector.load %arg6[%239, %c0_59] : memref<16x32xf32, #tpu.memory_space<vmem>>, vector<2x32xf32>
    tpu.vector_store %arg6[%239, %c0_59], %238 {strides = array<i32>} : memref<16x32xf32, #tpu.memory_space<vmem>>, vector<2x32xf32>,
    %c7_i32 = arith.constant 7 : i32
    %c2_i32_60 = arith.constant 2 : i32
    %241 = arith.muli %c7_i32, %c2_i32_60 : i32
    %242 = tpu.assume_multiple %241, 2 : i32
    %243 = arith.index_cast %242 : i32 to index
    %c0_61 = arith.constant 0 : index
    %244 = vector.load %arg7[%243, %c0_61] : memref<16x128xf32, #tpu.memory_space<vmem>>, vector<2x128xf32>
    %cst_62 = arith.constant dense<0.000000e+00> : vector<2x128xf32>
    %245 = tpu.matmul %238, %7, %cst_62 {dimension_numbers = #tpu.dot_dimension_numbers<[1], [0], [0], [1], [0, 0, 1, 1], [], []>} : vector<2x32xf32>, vector<32x128xf32>, vector<2x128xf32> -> vector<2x128xf32>
    %246 = arith.addf %244, %245 : vector<2x128xf32>
    %247 = vector.extract_strided_slice %246 {offsets = [0, 0], sizes = [2, 32], strides = [1, 1]} : vector<2x128xf32> to vector<2x32xf32>
    %248 = arith.negf %247 : vector<2x32xf32>
    %249 = math.exp %248 : vector<2x32xf32>
    %cst_63 = arith.constant 1.000000e+00 : f32
    %250 = vector.broadcast %cst_63 : f32 to vector<2x32xf32>
    %251 = arith.addf %250, %249 : vector<2x32xf32>
    %252 = arith.divf %250, %251 : vector<2x32xf32>
    %253 = vector.extract_strided_slice %246 {offsets = [0, 32], sizes = [2, 32], strides = [1, 1]} : vector<2x128xf32> to vector<2x32xf32>
    %254 = arith.negf %253 : vector<2x32xf32>
    %255 = math.exp %254 : vector<2x32xf32>
    %cst_64 = arith.constant 1.000000e+00 : f32
    %256 = vector.broadcast %cst_64 : f32 to vector<2x32xf32>
    %257 = arith.addf %256, %255 : vector<2x32xf32>
    %258 = arith.divf %256, %257 : vector<2x32xf32>
    %259 = vector.extract_strided_slice %246 {offsets = [0, 64], sizes = [2, 32], strides = [1, 1]} : vector<2x128xf32> to vector<2x32xf32>
    %260 = math.tanh %259 : vector<2x32xf32>
    %261 = vector.extract_strided_slice %246 {offsets = [0, 96], sizes = [2, 32], strides = [1, 1]} : vector<2x128xf32> to vector<2x32xf32>
    %262 = arith.negf %261 : vector<2x32xf32>
    %263 = math.exp %262 : vector<2x32xf32>
    %cst_65 = arith.constant 1.000000e+00 : f32
    %264 = vector.broadcast %cst_65 : f32 to vector<2x32xf32>
    %265 = arith.addf %264, %263 : vector<2x32xf32>
    %266 = arith.divf %264, %265 : vector<2x32xf32>
    %267 = arith.mulf %258, %236 : vector<2x32xf32>
    %268 = arith.mulf %252, %260 : vector<2x32xf32>
    %269 = arith.addf %267, %268 : vector<2x32xf32>
    %270 = math.tanh %269 : vector<2x32xf32>
    %271 = arith.mulf %266, %270 : vector<2x32xf32>
    %272 = arith.index_cast %242 : i32 to index
    %c0_66 = arith.constant 0 : index
    %273 = vector.load %arg6[%272, %c0_66] : memref<16x32xf32, #tpu.memory_space<vmem>>, vector<2x32xf32>
    tpu.vector_store %arg6[%272, %c0_66], %271 {strides = array<i32>} : memref<16x32xf32, #tpu.memory_space<vmem>>, vector<2x32xf32>,
    %c8_i32 = arith.constant 8 : i32
    %c0_67 = arith.constant 0 : index
    %c0_68 = arith.constant 0 : index
    %274 = vector.load %arg6[%c0_67, %c0_68] : memref<16x32xf32, #tpu.memory_space<vmem>>, vector<16x32xf32>
    %cst_69 = arith.constant dense<0.000000e+00> : vector<32xf32>
    %275 = vector.multi_reduction <add>, %274, %cst_69 [0] : vector<16x32xf32> to vector<32xf32>
    %276 = vector.shape_cast %275 : vector<32xf32> to vector<1x32xf32>
    %cst_70 = arith.constant 6.250000e-02 : f32
    %277 = vector.broadcast %cst_70 : f32 to vector<1x32xf32>
    %278 = arith.mulf %276, %277 : vector<1x32xf32>
    %279 = vector.broadcast %278 : vector<1x32xf32> to vector<16x32xf32>
    %280 = arith.subf %274, %279 : vector<16x32xf32>
    %281 = arith.mulf %280, %280 : vector<16x32xf32>
    %cst_71 = arith.constant dense<0.000000e+00> : vector<32xf32>
    %282 = vector.multi_reduction <add>, %281, %cst_71 [0] : vector<16x32xf32> to vector<32xf32>
    %283 = vector.shape_cast %282 : vector<32xf32> to vector<1x32xf32>
    %cst_72 = arith.constant 6.250000e-02 : f32
    %284 = vector.broadcast %cst_72 : f32 to vector<1x32xf32>
    %285 = arith.mulf %283, %284 : vector<1x32xf32>
    %cst_73 = arith.constant 9.99999974E-6 : f32
    %286 = vector.broadcast %cst_73 : f32 to vector<1x32xf32>
    %287 = arith.addf %285, %286 : vector<1x32xf32>
    %288 = math.rsqrt %287 : vector<1x32xf32>
    %289 = vector.broadcast %288 : vector<1x32xf32> to vector<16x32xf32>
    %290 = arith.mulf %280, %289 : vector<16x32xf32>
    %c0_74 = arith.constant 0 : index
    %c0_75 = arith.constant 0 : index
    %291 = vector.load %arg4[%c0_74, %c0_75] : memref<1x32xf32, #tpu.memory_space<vmem>>, vector<1x32xf32>
    %292 = vector.broadcast %291 : vector<1x32xf32> to vector<16x32xf32>
    %293 = arith.mulf %290, %292 : vector<16x32xf32>
    %c0_76 = arith.constant 0 : index
    %c0_77 = arith.constant 0 : index
    %294 = vector.load %arg5[%c0_76, %c0_77] : memref<1x32xf32, #tpu.memory_space<vmem>>, vector<1x32xf32>
    %295 = vector.broadcast %294 : vector<1x32xf32> to vector<16x32xf32>
    %296 = arith.addf %293, %295 : vector<16x32xf32>
    %c0_78 = arith.constant 0 : index
    %c0_79 = arith.constant 0 : index
    %297 = vector.load %arg6[%c0_78, %c0_79] : memref<16x32xf32, #tpu.memory_space<vmem>>, vector<16x32xf32>
    tpu.vector_store %arg6[%c0_78, %c0_79], %296 {strides = array<i32>} : memref<16x32xf32, #tpu.memory_space<vmem>>, vector<16x32xf32>,
    return
  }
}

</mosaic_0001>

<bundles_post_ra>
// kernel: group_rnn_forward.3
= control target key start
LH: loop header
LB: loop body
LE: loop exit
PB: predicated region body
PF: predicated region fallthrough
CT: control target
= control target key end

     0   :  { %11 = vsyncpa [#allocation4], 0  ;;  %s1014_s0 = inlined_call_operand.vmem [shape: f32[16,32], index: 0, kind: input, shape index: {}]   ;;  %s1015_s1 = inlined_call_operand.hbm [shape: f32[32,128], index: 1, kind: input, shape index: {}]   ;;  %s1016_s2 = inlined_call_operand.hbm [shape: f32[32,128], index: 2, kind: input, shape index: {}]   ;;  %s1017_s3 = inlined_call_operand.vmem [shape: f32[1,128], index: 3, kind: input, shape index: {}]   ;;  %s1018_s4 = inlined_call_operand.vmem [shape: f32[1,32], index: 4, kind: input, shape index: {}]   ;;  %s1019_s5 = inlined_call_operand.vmem [shape: f32[1,32], index: 5, kind: input, shape index: {}]   ;;  %s1020_s6 = inlined_call_operand.vmem [shape: f32[16,32], index: 6, kind: output, shape index: {}]  }
   0x1   :  { %s19_s23 = sshll.u32 %s1015_s1, 4  ;;  %s20_s23 = int_to_ptr.hbm [resolvable:$true] %s19_s23 }
   0x2   :  { %12 = vsyncpa [#allocation6], 0  ;;  %s856_s24 = smov [#allocation3]   ;;  %s32_s28 = sshll.u32 %s1016_s2, 4  ;;  %s33_s28 = int_to_ptr.hbm [resolvable:$true] %s32_s28 }
   0x3   :  { %s21_s25 = sshll.u32 %s856_s24, 4  ;;  %s857_s29 = smov 128   ;;  %s22_s25 = int_to_ptr.vmem [resolvable:$true] %s21_s25 }
   0x4   :  { %s858_s30 = smov 8   ;;  %s859_s7 = smov [#allocation5]  }
   0x5   :  { %27 = dma.hbm_to_vmem [thread:$0]  %s20_s23, 512, %s22_s25, [#allocation4], %s857_s29, %s857_s29, %s858_s30  }
   0x6   :  { %s34_s8 = sshll.u32 %s859_s7, 4  ;;  %s35_s8 = int_to_ptr.vmem [resolvable:$true] %s34_s8 }
   0x7   :  { %40 = dma.hbm_to_vmem [thread:$0]  %s33_s28, 512, %s35_s8, [#allocation6], %s857_s29, %s857_s29, %s858_s30  }
   0x8   :  { %852 = dma.done.wait [#allocation4], 512  }
   0x9   :  { %853 = vsyncadd [#allocation4], 4294966784 }
   0xa   :  { %854 = dma.done.wait [#allocation6], 512  }
   0xb   :  { %855 = vsyncadd [#allocation6], 4294966784  ;;  %v60_v0 = vld [vmem:[#allocation3 + $0x18] sm:$0xff]  ;;  %v59_v1 = vld [vmem:[#allocation3 + $0x10] sm:$0xff]  ;;  %vm65_vm0 = vcmask 261120   ;;  %v860_v9 = vmov 0.0  }
   0xc   :  { %84 = vmatpush.msra.mxu0 %v60_v0  ;;  %v100_v2 = vld [vmem:[#allocation5 + $0x18] sm:$0xff]  ;;  %v58_v3 = vld [vmem:[#allocation3 + $0x8] sm:$0xff]  ;;  %v99_v4 = vld [vmem:[#allocation5 + $0x10] sm:$0xff]  ;;  %s861_s11 = smov 64   ;;  %vm167_vm5 = vcmask 254976  }
   0xd   :  { %117 = vmatpush.msra.mxu1 %v100_v2  ;;  %185 = vmatpush.msra.mxu2 %v100_v2  ;;  %v98_v5 = vld [vmem:[#allocation5 + $0x8] sm:$0xff]  ;;  %v57_v6 = vld [vmem:[#allocation3] sm:$0xff]  ;;  %v55_v7 = vld [vmem:[%s1014_s0] sm:$0xff] }
   0xe   :  { %85 = vmatpush.msra.mxu0 %v59_v1  ;;  %253 = vmatpush.msra.mxu3 %v100_v2  ;;  %v97_v8 = vld [vmem:[#allocation5] sm:$0xff]  ;;  %v911_v10 = vld [vmem:[%s1017_s3] ss:$0 sm:$0xff]  ;;  %s862_s3 = smov 32  }
   0xf   :  { %118 = vmatpush.msra.mxu1 %v99_v4  ;;  %186 = vmatpush.msra.mxu2 %v99_v4 }
  0x10   :  { %86 = vmatpush.msra.mxu0 %v58_v3  ;;  %254 = vmatpush.msra.mxu3 %v99_v4 }
  0x11   :  { %119 = vmatpush.msra.mxu1 %v98_v5  ;;  %187 = vmatpush.msra.mxu2 %v98_v5 }
  0x12   :  { %87 = vmatpush.msra.mxu0 %v57_v6  ;;  %255 = vmatpush.msra.mxu3 %v98_v5 }
  0x13   :  { %704 = vmatmul.msk.f32.vlgmr.msra.gmra.mxu0 %vm65_vm0, %v55_v7  ;;  %120 = vmatpush.msra.mxu1 %v97_v8 }
  0x14   :  { %121 = vmatmul.f32.vlgmr.msra.gmra.mxu1 %v860_v9  ;;  %188 = vmatpush.msra.mxu2 %v97_v8 }
  0x15   :  { %256 = vmatpush.msra.mxu3 %v97_v8  ;;  %321 = vmatpush.msrb.mxu1 %v100_v2 }
  0x16   :  { %389 = vmatpush.msrb.mxu2 %v100_v2  ;;  %525 = vmatpush.msrb.mxu0 %v100_v2 }
  0x17   :  { %457 = vmatpush.msrb.mxu3 %v100_v2  ;;  %322 = vmatpush.msrb.mxu1 %v99_v4 }
  0x18   :  { %390 = vmatpush.msrb.mxu2 %v99_v4  ;;  %526 = vmatpush.msrb.mxu0 %v99_v4 }
  0x19   :  { %458 = vmatpush.msrb.mxu3 %v99_v4  ;;  %323 = vmatpush.msrb.mxu1 %v98_v5 }
  0x1a   :  { %391 = vmatpush.msrb.mxu2 %v98_v5  ;;  %527 = vmatpush.msrb.mxu0 %v98_v5 }
  0x1b   :  { %459 = vmatpush.msrb.mxu3 %v98_v5  ;;  %324 = vmatpush.msrb.mxu1 %v97_v8 }
  0x1c   :  { %392 = vmatpush.msrb.mxu2 %v97_v8  ;;  %528 = vmatpush.msrb.mxu0 %v97_v8 }
  0x1d   :  { %460 = vmatpush.msrb.mxu3 %v97_v8  ;;  %593 = vmatpush.msra.mxu1 %v100_v2 }
  0x1f   :  { %594 = vmatpush.msra.mxu1 %v99_v4 }
  0x21   :  { %595 = vmatpush.msra.mxu1 %v98_v5 }
  0x23   :  { %596 = vmatpush.msra.mxu1 %v97_v8 }
  0x90   :  { %v89_v11 = vpop.f32.mrf.mxu0 }
  0x91   :  { %v90_v12 = vadd.f32 %v911_v10, %v89_v11  ;;  %v122_v13 = vpop.f32.mrf.mxu1 }
  0x93   :  { %95 = vst [vmem:[#allocation2] sm:$0xff] %v90_v12 }
  0x9a   :  { %v101_v14 = vld [vmem:[#allocation2] sm:$0x3]  ;;  %v170_v39 = vld [vmem:[#allocation2 + $0x2] sm:$0x3]  ;;  %v238_v1 = vld [vmem:[#allocation2 + $0x4] sm:$0x3] }
  0x9b   :  { %v125_v15 = vadd.f32 %v122_v13, %v101_v14 }
  0x9d   :  { %738 = vtanh.f32 %v125_v15  ;;  %v706_v17 = vmul.f32 -1.442695, %v125_v15 }
  0x9f   :  { %740 = vpow2.f32 %v706_v17 }
  0xa3   :  { %v739_v16 = vpop.eup %738 }
  0xa4   :  { %148 = vrot.lane.b32.xlu0 %v739_v16, %s861_s11 }
  0xa5   :  { %v741_v18 = vpop.eup %740 }
  0xa6   :  { %v129_v19 = vadd.f32 1.0, %v741_v18 }
  0xa8   :  { %742 = vrcp.f32 %v129_v19  ;;  %v141_v25 = vand.u32 2147483648, %v129_v19  ;;  %vm135_vm2 = vweird.f32 %v129_v19  ;;  %v139_v26 = vand.u32 2147483647, %v129_v19 }
  0xaa   :  { %v142_v28 = vor.u32 1.1754944e-38, %v141_v25  ;;  %vm140_vm4 = vcmp.eq.f32.partialorder %v139_v26, 8.507059e+37 }
  0xae   :  { %v743_v20 = vpop.eup %742 }
  0xaf   :  { %v131_v21 = vmul.f32 %v743_v20, %v129_v19  ;;  %vm136_vm1 = vweird.f32 %v743_v20 }
  0xb0   :  { %vm137_vm3 = vmor %vm135_vm2, %vm136_vm1 }
  0xb1   :  { %v132_v22 = vsub.f32 1.0, %v131_v21 }
  0xb3   :  { %v133_v23 = vmul.f32 %v743_v20, %v132_v22 }
  0xb5   :  { %v134_v24 = vadd.f32 %v743_v20, %v133_v23 }
  0xb7   :  { %v138_v27 = vsel %vm137_vm3, %v743_v20, %v134_v24 }
  0xb8   :  { %v143_v30 = vsel %vm140_vm4, %v142_v28, %v138_v27  ;;  %v306_v28 = vld [vmem:[#allocation2 + $0x6] sm:$0x3] }
  0xb9   :  { %v146_v32 = vmul.f32 0.0, %v143_v30 }
 0x116   :  { %v149_v29 = vpop.permute.xlu0 %148 }
 0x117   :  { %v151_v31 = vmul.f32 %v149_v29, %v143_v30 }
 0x119   :  { %153 = vrot.lane.b32.xlu0 %v151_v31, %s862_s3 }
 0x18b   :  { %v154_v33 = vpop.permute.xlu0 %153 }
 0x18c   :  { %v156_v34 = vadd.f32 %v154_v33, %v146_v32 }
 0x18e   :  { %744 = vtanh.f32 %v156_v34 }
 0x194   :  { %v745_v35 = vpop.eup %744 }
 0x195   :  { %159 = vrot.lane.b32.xlu1 %v745_v35, %s861_s11 }
 0x207   :  { %v160_v36 = vpop.permute.xlu1 %159 }
 0x208   :  { %v162_v37 = vmul.f32 %v160_v36, %v143_v30 }
 0x20a   :  { %164 = vrot.lane.b32.xlu1 %v162_v37, %s862_s3 }
 0x27c   :  { %v165_v38 = vpop.permute.xlu1 %164 }
 0x27d   :  { %168 = vst.msk [vmem:[%s1020_s6] sm:$0x3] %vm167_vm5, %v165_v38  ;;  %707 = vmatmul.msk.f32.vlgmr.msra.gmra.mxu2 %vm65_vm0, %v165_v38 }
 0x300   :  { %v190_v40 = vpop.f32.mrf.mxu2 }
 0x301   :  { %v193_v41 = vadd.f32 %v190_v40, %v170_v39 }
 0x303   :  { %746 = vtanh.f32 %v193_v41  ;;  %v708_v43 = vmul.f32 -1.442695, %v193_v41 }
 0x305   :  { %748 = vpow2.f32 %v708_v43 }
 0x309   :  { %v747_v42 = vpop.eup %746 }
 0x30a   :  { %216 = vrot.lane.b32.xlu2 %v747_v42, %s861_s11 }
 0x30b   :  { %v749_v44 = vpop.eup %748 }
 0x30c   :  { %v197_v45 = vadd.f32 1.0, %v749_v44 }
 0x30e   :  { %750 = vrcp.f32 %v197_v45  ;;  %v209_v51 = vand.u32 2147483648, %v197_v45  ;;  %vm203_vm7 = vweird.f32 %v197_v45  ;;  %v207_v52 = vand.u32 2147483647, %v197_v45 }
 0x310   :  { %v210_v54 = vor.u32 1.1754944e-38, %v209_v51  ;;  %vm208_vm9 = vcmp.eq.f32.partialorder %v207_v52, 8.507059e+37  ;;  %v56_v51 = vld [vmem:[%s1014_s0 + $0x8] sm:$0xff] }
 0x311   :  { %705 = vmatmul.msk.f32.gmra.mxu0 %vm65_vm0, %v56_v51 }
 0x314   :  { %v751_v46 = vpop.eup %750 }
 0x315   :  { %v199_v47 = vmul.f32 %v751_v46, %v197_v45  ;;  %vm204_vm6 = vweird.f32 %v751_v46 }
 0x316   :  { %vm205_vm8 = vmor %vm203_vm7, %vm204_vm6 }
 0x317   :  { %v200_v48 = vsub.f32 1.0, %v199_v47 }
 0x319   :  { %v201_v49 = vmul.f32 %v751_v46, %v200_v48 }
 0x31b   :  { %v202_v50 = vadd.f32 %v751_v46, %v201_v49 }
 0x31d   :  { %v206_v53 = vsel %vm205_vm8, %v751_v46, %v202_v50 }
 0x31e   :  { %v211_v56 = vsel %vm208_vm9, %v210_v54, %v206_v53 }
 0x31f   :  { %v214_v58 = vmul.f32 %v211_v56, %v156_v34 }
 0x364   :  { %v217_v55 = vpop.permute.xlu2 %216 }
 0x365   :  { %v219_v57 = vmul.f32 %v217_v55, %v211_v56 }
 0x367   :  { %221 = vrot.lane.b32.xlu2 %v219_v57, %s862_s3 }
 0x38e   :  { %v92_v54 = vpop.f32.mrf.mxu0 }
 0x38f   :  { %v93_v55 = vadd.f32 %v911_v10, %v92_v54 }
 0x391   :  { %96 = vst [vmem:[#allocation2 + $0x8] sm:$0xff] %v93_v55 }
 0x398   :  { %v374_v57 = vld [vmem:[#allocation2 + $0x8] sm:$0x3] }
 0x3c1   :  { %v222_v59 = vpop.permute.xlu2 %221 }
 0x3c2   :  { %v224_v60 = vadd.f32 %v222_v59, %v214_v58 }
 0x3c4   :  { %752 = vtanh.f32 %v224_v60 }
 0x3ca   :  { %v753_v61 = vpop.eup %752 }
 0x3cb   :  { %227 = vrot.lane.b32.xlu0 %v753_v61, %s861_s11 }
 0x43d   :  { %v228_v62 = vpop.permute.xlu0 %227 }
 0x43e   :  { %v230_v63 = vmul.f32 %v228_v62, %v211_v56 }
 0x440   :  { %232 = vrot.lane.b32.xlu1 %v230_v63, %s862_s3 }
 0x4b2   :  { %v233_v0 = vpop.permute.xlu1 %232 }
 0x4b3   :  { %709 = vst.msk [vmem:[%s1020_s6 + $0x2] sm:$0x3] %vm167_vm5, %v233_v0  ;;  %710 = vmatmul.msk.f32.vlgmr.msra.gmra.mxu3 %vm65_vm0, %v233_v0 }
 0x536   :  { %v258_v2 = vpop.f32.mrf.mxu3 }
 0x537   :  { %v261_v3 = vadd.f32 %v258_v2, %v238_v1 }
 0x539   :  { %754 = vtanh.f32 %v261_v3  ;;  %v711_v5 = vmul.f32 -1.442695, %v261_v3 }
 0x53b   :  { %756 = vpow2.f32 %v711_v5 }
 0x53f   :  { %v755_v4 = vpop.eup %754 }
 0x540   :  { %284 = vrot.lane.b32.xlu2 %v755_v4, %s861_s11 }
 0x541   :  { %v757_v6 = vpop.eup %756 }
 0x542   :  { %v265_v7 = vadd.f32 1.0, %v757_v6 }
 0x544   :  { %758 = vrcp.f32 %v265_v7  ;;  %v277_v14 = vand.u32 2147483648, %v265_v7  ;;  %vm271_vm11 = vweird.f32 %v265_v7  ;;  %v275_v15 = vand.u32 2147483647, %v265_v7 }
 0x546   :  { %v278_v17 = vor.u32 1.1754944e-38, %v277_v14  ;;  %vm276_vm13 = vcmp.eq.f32.partialorder %v275_v15, 8.507059e+37 }
 0x54a   :  { %v759_v8 = vpop.eup %758 }
 0x54b   :  { %v267_v9 = vmul.f32 %v759_v8, %v265_v7  ;;  %vm272_vm10 = vweird.f32 %v759_v8 }
 0x54c   :  { %vm273_vm12 = vmor %vm271_vm11, %vm272_vm10 }
 0x54d   :  { %v268_v11 = vsub.f32 1.0, %v267_v9 }
 0x54f   :  { %v269_v12 = vmul.f32 %v759_v8, %v268_v11 }
 0x551   :  { %v270_v13 = vadd.f32 %v759_v8, %v269_v12 }
 0x553   :  { %v274_v16 = vsel %vm273_vm12, %v759_v8, %v270_v13 }
 0x554   :  { %v279_v19 = vsel %vm276_vm13, %v278_v17, %v274_v16 }
 0x555   :  { %v282_v21 = vmul.f32 %v279_v19, %v224_v60 }
 0x59a   :  { %v285_v18 = vpop.permute.xlu2 %284 }
 0x59b   :  { %v287_v20 = vmul.f32 %v285_v18, %v279_v19 }
 0x59d   :  { %289 = vrot.lane.b32.xlu0 %v287_v20, %s862_s3 }
 0x60f   :  { %v290_v22 = vpop.permute.xlu0 %289 }
 0x610   :  { %v292_v23 = vadd.f32 %v290_v22, %v282_v21 }
 0x612   :  { %760 = vtanh.f32 %v292_v23 }
 0x618   :  { %v761_v24 = vpop.eup %760 }
 0x619   :  { %295 = vrot.lane.b32.xlu1 %v761_v24, %s861_s11 }
 0x68b   :  { %v296_v25 = vpop.permute.xlu1 %295 }
 0x68c   :  { %v298_v26 = vmul.f32 %v296_v25, %v279_v19  ;;  %v442_v19 = vld [vmem:[#allocation2 + $0xa] sm:$0x3] }
 0x68e   :  { %300 = vrot.lane.b32.xlu2 %v298_v26, %s862_s3 }
 0x6e8   :  { %v301_v27 = vpop.permute.xlu2 %300 }
 0x6e9   :  { %712 = vst.msk [vmem:[%s1020_s6 + $0x4] sm:$0x3] %vm167_vm5, %v301_v27  ;;  %713 = vmatmul.msk.f32.vlgmr.msrb.gmra.mxu1 %vm65_vm0, %v301_v27 }
 0x766   :  { %v326_v29 = vpop.f32.mrf.mxu1 }
 0x767   :  { %v329_v30 = vadd.f32 %v326_v29, %v306_v28 }
 0x769   :  { %762 = vtanh.f32 %v329_v30  ;;  %v714_v32 = vmul.f32 -1.442695, %v329_v30 }
 0x76b   :  { %764 = vpow2.f32 %v714_v32 }
 0x76f   :  { %v763_v31 = vpop.eup %762 }
 0x770   :  { %352 = vrot.lane.b32.xlu0 %v763_v31, %s861_s11 }
 0x771   :  { %v765_v33 = vpop.eup %764 }
 0x772   :  { %v333_v34 = vadd.f32 1.0, %v765_v33 }
 0x774   :  { %766 = vrcp.f32 %v333_v34  ;;  %v345_v40 = vand.u32 2147483648, %v333_v34  ;;  %vm339_vm15 = vweird.f32 %v333_v34  ;;  %v343_v41 = vand.u32 2147483647, %v333_v34 }
 0x776   :  { %v346_v43 = vor.u32 1.1754944e-38, %v345_v40  ;;  %vm344_vm2 = vcmp.eq.f32.partialorder %v343_v41, 8.507059e+37 }
 0x77a   :  { %v767_v35 = vpop.eup %766 }
 0x77b   :  { %v335_v36 = vmul.f32 %v767_v35, %v333_v34  ;;  %vm340_vm14 = vweird.f32 %v767_v35 }
 0x77c   :  { %vm341_vm1 = vmor %vm339_vm15, %vm340_vm14 }
 0x77d   :  { %v336_v37 = vsub.f32 1.0, %v335_v36 }
 0x77f   :  { %v337_v38 = vmul.f32 %v767_v35, %v336_v37 }
 0x781   :  { %v338_v39 = vadd.f32 %v767_v35, %v337_v38 }
 0x783   :  { %v342_v42 = vsel %vm341_vm1, %v767_v35, %v338_v39 }
 0x784   :  { %v347_v45 = vsel %vm344_vm2, %v346_v43, %v342_v42 }
 0x785   :  { %v350_v47 = vmul.f32 %v347_v45, %v292_v23 }
 0x7e2   :  { %v353_v44 = vpop.permute.xlu0 %352 }
 0x7e3   :  { %v355_v46 = vmul.f32 %v353_v44, %v347_v45 }
 0x7e5   :  { %357 = vrot.lane.b32.xlu1 %v355_v46, %s862_s3 }
 0x857   :  { %v358_v48 = vpop.permute.xlu1 %357 }
 0x858   :  { %v360_v49 = vadd.f32 %v358_v48, %v350_v47 }
 0x85a   :  { %768 = vtanh.f32 %v360_v49 }
 0x860   :  { %v769_v50 = vpop.eup %768 }
 0x861   :  { %363 = vrot.lane.b32.xlu2 %v769_v50, %s861_s11 }
 0x8bb   :  { %v364_v52 = vpop.permute.xlu2 %363 }
 0x8bc   :  { %v366_v53 = vmul.f32 %v364_v52, %v347_v45  ;;  %v510_v45 = vld [vmem:[#allocation2 + $0xc] sm:$0x3] }
 0x8be   :  { %368 = vrot.lane.b32.xlu0 %v366_v53, %s862_s3 }
 0x930   :  { %v369_v56 = vpop.permute.xlu0 %368 }
 0x931   :  { %715 = vst.msk [vmem:[%s1020_s6 + $0x6] sm:$0x3] %vm167_vm5, %v369_v56  ;;  %716 = vmatmul.msk.f32.vlgmr.msrb.gmra.mxu2 %vm65_vm0, %v369_v56 }
 0x9b4   :  { %v394_v58 = vpop.f32.mrf.mxu2 }
 0x9b5   :  { %v397_v59 = vadd.f32 %v394_v58, %v374_v57 }
 0x9b7   :  { %770 = vtanh.f32 %v397_v59  ;;  %v717_v61 = vmul.f32 -1.442695, %v397_v59 }
 0x9b9   :  { %772 = vpow2.f32 %v717_v61 }
 0x9bd   :  { %v771_v60 = vpop.eup %770 }
 0x9be   :  { %420 = vrot.lane.b32.xlu1 %v771_v60, %s861_s11 }
 0x9bf   :  { %v773_v62 = vpop.eup %772 }
 0x9c0   :  { %v401_v10 = vadd.f32 1.0, %v773_v62 }
 0x9c2   :  { %774 = vrcp.f32 %v401_v10  ;;  %v413_v4 = vand.u32 2147483648, %v401_v10  ;;  %vm407_vm4 = vweird.f32 %v401_v10  ;;  %v411_v5 = vand.u32 2147483647, %v401_v10 }
 0x9c4   :  { %v414_v7 = vor.u32 1.1754944e-38, %v413_v4  ;;  %vm412_vm7 = vcmp.eq.f32.partialorder %v411_v5, 8.507059e+37 }
 0x9c8   :  { %v775_v63 = vpop.eup %774 }
 0x9c9   :  { %v403_v0 = vmul.f32 %v775_v63, %v401_v10  ;;  %vm408_vm3 = vweird.f32 %v775_v63 }
 0x9ca   :  { %vm409_vm6 = vmor %vm407_vm4, %vm408_vm3 }
 0x9cb   :  { %v404_v1 = vsub.f32 1.0, %v403_v0 }
 0x9cd   :  { %v405_v2 = vmul.f32 %v775_v63, %v404_v1 }
 0x9cf   :  { %v406_v3 = vadd.f32 %v775_v63, %v405_v2 }
 0x9d1   :  { %v410_v6 = vsel %vm409_vm6, %v775_v63, %v406_v3 }
 0x9d2   :  { %v415_v9 = vsel %vm412_vm7, %v414_v7, %v410_v6  ;;  %v578_v6 = vld [vmem:[#allocation2 + $0xe] sm:$0x3] }
 0x9d3   :  { %v418_v12 = vmul.f32 %v415_v9, %v360_v49 }
 0xa30   :  { %v421_v8 = vpop.permute.xlu1 %420 }
 0xa31   :  { %v423_v11 = vmul.f32 %v421_v8, %v415_v9 }
 0xa33   :  { %425 = vrot.lane.b32.xlu2 %v423_v11, %s862_s3 }
 0xa8d   :  { %v426_v13 = vpop.permute.xlu2 %425 }
 0xa8e   :  { %v428_v14 = vadd.f32 %v426_v13, %v418_v12 }
 0xa90   :  { %776 = vtanh.f32 %v428_v14 }
 0xa96   :  { %v777_v15 = vpop.eup %776 }
 0xa97   :  { %431 = vrot.lane.b32.xlu0 %v777_v15, %s861_s11 }
 0xb09   :  { %v432_v16 = vpop.permute.xlu0 %431 }
 0xb0a   :  { %v434_v17 = vmul.f32 %v432_v16, %v415_v9 }
 0xb0c   :  { %436 = vrot.lane.b32.xlu1 %v434_v17, %s862_s3 }
 0xb7e   :  { %v437_v18 = vpop.permute.xlu1 %436 }
 0xb7f   :  { %718 = vst.msk [vmem:[%s1020_s6 + $0x8] sm:$0x3] %vm167_vm5, %v437_v18  ;;  %719 = vmatmul.msk.f32.vlgmr.msrb.gmra.mxu3 %vm65_vm0, %v437_v18 }
 0xc02   :  { %v462_v20 = vpop.f32.mrf.mxu3 }
 0xc03   :  { %v465_v21 = vadd.f32 %v462_v20, %v442_v19 }
 0xc05   :  { %778 = vtanh.f32 %v465_v21  ;;  %v720_v23 = vmul.f32 -1.442695, %v465_v21 }
 0xc07   :  { %780 = vpow2.f32 %v720_v23 }
 0xc0b   :  { %v779_v22 = vpop.eup %778 }
 0xc0c   :  { %488 = vrot.lane.b32.xlu2 %v779_v22, %s861_s11 }
 0xc0d   :  { %v781_v24 = vpop.eup %780 }
 0xc0e   :  { %v469_v25 = vadd.f32 1.0, %v781_v24 }
 0xc10   :  { %782 = vrcp.f32 %v469_v25  ;;  %v481_v31 = vand.u32 2147483648, %v469_v25  ;;  %vm475_vm9 = vweird.f32 %v469_v25  ;;  %v479_v32 = vand.u32 2147483647, %v469_v25 }
 0xc12   :  { %v482_v34 = vor.u32 1.1754944e-38, %v481_v31  ;;  %vm480_vm11 = vcmp.eq.f32.partialorder %v479_v32, 8.507059e+37 }
 0xc16   :  { %v783_v26 = vpop.eup %782 }
 0xc17   :  { %v471_v27 = vmul.f32 %v783_v26, %v469_v25  ;;  %vm476_vm8 = vweird.f32 %v783_v26 }
 0xc18   :  { %vm477_vm10 = vmor %vm475_vm9, %vm476_vm8 }
 0xc19   :  { %v472_v28 = vsub.f32 1.0, %v471_v27 }
 0xc1b   :  { %v473_v29 = vmul.f32 %v783_v26, %v472_v28 }
 0xc1d   :  { %v474_v30 = vadd.f32 %v783_v26, %v473_v29 }
 0xc1f   :  { %v478_v33 = vsel %vm477_vm10, %v783_v26, %v474_v30 }
 0xc20   :  { %v483_v36 = vsel %vm480_vm11, %v482_v34, %v478_v33  ;;  %v645_v33 = vld [vmem:[%s1020_s6] sm:$0xff] }
 0xc21   :  { %v486_v38 = vmul.f32 %v483_v36, %v428_v14 }
 0xc66   :  { %v489_v35 = vpop.permute.xlu2 %488 }
 0xc67   :  { %v491_v37 = vmul.f32 %v489_v35, %v483_v36  ;;  %v647_v35 = vsel %vm65_vm0, %v645_v33, 0.0 }
 0xc69   :  { %493 = vrot.lane.b32.xlu0 %v491_v37, %s862_s3 }
 0xcdb   :  { %v494_v39 = vpop.permute.xlu0 %493 }
 0xcdc   :  { %v496_v40 = vadd.f32 %v494_v39, %v486_v38 }
 0xcde   :  { %784 = vtanh.f32 %v496_v40 }
 0xce4   :  { %v785_v41 = vpop.eup %784 }
 0xce5   :  { %499 = vrot.lane.b32.xlu1 %v785_v41, %s861_s11 }
 0xd57   :  { %v500_v42 = vpop.permute.xlu1 %499 }
 0xd58   :  { %v502_v43 = vmul.f32 %v500_v42, %v483_v36 }
 0xd5a   :  { %504 = vrot.lane.b32.xlu2 %v502_v43, %s862_s3 }
 0xdb4   :  { %v505_v44 = vpop.permute.xlu2 %504 }
 0xdb5   :  { %721 = vst.msk [vmem:[%s1020_s6 + $0xa] sm:$0x3] %vm167_vm5, %v505_v44  ;;  %722 = vmatmul.msk.f32.vlgmr.msrb.gmra.mxu0 %vm65_vm0, %v505_v44 }
 0xe32   :  { %v530_v46 = vpop.f32.mrf.mxu0 }
 0xe33   :  { %v533_v47 = vadd.f32 %v530_v46, %v510_v45 }
 0xe35   :  { %786 = vtanh.f32 %v533_v47  ;;  %v723_v49 = vmul.f32 -1.442695, %v533_v47 }
 0xe37   :  { %788 = vpow2.f32 %v723_v49 }
 0xe3b   :  { %v787_v48 = vpop.eup %786 }
 0xe3c   :  { %556 = vrot.lane.b32.xlu0 %v787_v48, %s861_s11 }
 0xe3d   :  { %v789_v50 = vpop.eup %788 }
 0xe3e   :  { %v537_v51 = vadd.f32 1.0, %v789_v50 }
 0xe40   :  { %790 = vrcp.f32 %v537_v51  ;;  %v549_v57 = vand.u32 2147483648, %v537_v51  ;;  %vm543_vm13 = vweird.f32 %v537_v51  ;;  %v547_v58 = vand.u32 2147483647, %v537_v51 }
 0xe42   :  { %v550_v60 = vor.u32 1.1754944e-38, %v549_v57  ;;  %vm548_vm15 = vcmp.eq.f32.partialorder %v547_v58, 8.507059e+37 }
 0xe46   :  { %v791_v52 = vpop.eup %790 }
 0xe47   :  { %v539_v53 = vmul.f32 %v791_v52, %v537_v51  ;;  %vm544_vm12 = vweird.f32 %v791_v52 }
 0xe48   :  { %vm545_vm14 = vmor %vm543_vm13, %vm544_vm12 }
 0xe49   :  { %v540_v54 = vsub.f32 1.0, %v539_v53 }
 0xe4b   :  { %v541_v55 = vmul.f32 %v791_v52, %v540_v54 }
 0xe4d   :  { %v542_v56 = vadd.f32 %v791_v52, %v541_v55 }
 0xe4f   :  { %v546_v59 = vsel %vm545_vm14, %v791_v52, %v542_v56 }
 0xe50   :  { %v551_v62 = vsel %vm548_vm15, %v550_v60, %v546_v59 }
 0xe51   :  { %v554_v63 = vmul.f32 %v551_v62, %v496_v40 }
 0xeae   :  { %v557_v61 = vpop.permute.xlu0 %556 }
 0xeaf   :  { %v559_v10 = vmul.f32 %v557_v61, %v551_v62 }
 0xeb1   :  { %561 = vrot.lane.b32.xlu1 %v559_v10, %s862_s3 }
 0xf23   :  { %v562_v0 = vpop.permute.xlu1 %561 }
 0xf24   :  { %v564_v1 = vadd.f32 %v562_v0, %v554_v63 }
 0xf26   :  { %792 = vtanh.f32 %v564_v1 }
 0xf2c   :  { %v793_v2 = vpop.eup %792 }
 0xf2d   :  { %567 = vrot.lane.b32.xlu2 %v793_v2, %s861_s11 }
 0xf87   :  { %v568_v3 = vpop.permute.xlu2 %567 }
 0xf88   :  { %v570_v4 = vmul.f32 %v568_v3, %v551_v62  ;;  %v737_v3 = vld [vmem:[%s1019_s5] ss:$0 sm:$0xff] }
 0xf8a   :  { %572 = vrot.lane.b32.xlu0 %v570_v4, %s862_s3 }
 0xffc   :  { %v573_v5 = vpop.permute.xlu0 %572 }
 0xffd   :  { %724 = vst.msk [vmem:[%s1020_s6 + $0xc] sm:$0x3] %vm167_vm5, %v573_v5  ;;  %725 = vmatmul.msk.f32.vlgmr.msra.gmra.mxu1 %vm65_vm0, %v573_v5 }
0x107a   :  { %v598_v7 = vpop.f32.mrf.mxu1 }
0x107b   :  { %v601_v8 = vadd.f32 %v598_v7, %v578_v6 }
0x107d   :  { %794 = vtanh.f32 %v601_v8  ;;  %v726_v11 = vmul.f32 -1.442695, %v601_v8 }
0x107f   :  { %796 = vpow2.f32 %v726_v11 }
0x1083   :  { %v795_v9 = vpop.eup %794 }
0x1084   :  { %624 = vrot.lane.b32.xlu1 %v795_v9, %s861_s11 }
0x1085   :  { %v797_v12 = vpop.eup %796 }
0x1086   :  { %v605_v13 = vadd.f32 1.0, %v797_v12 }
0x1088   :  { %798 = vrcp.f32 %v605_v13  ;;  %v617_v19 = vand.u32 2147483648, %v605_v13  ;;  %vm611_vm2 = vweird.f32 %v605_v13  ;;  %v615_v20 = vand.u32 2147483647, %v605_v13 }
0x108a   :  { %v618_v22 = vor.u32 1.1754944e-38, %v617_v19  ;;  %vm616_vm4 = vcmp.eq.f32.partialorder %v615_v20, 8.507059e+37 }
0x108e   :  { %v799_v14 = vpop.eup %798 }
0x108f   :  { %v607_v15 = vmul.f32 %v799_v14, %v605_v13  ;;  %vm612_vm1 = vweird.f32 %v799_v14 }
0x1090   :  { %vm613_vm3 = vmor %vm611_vm2, %vm612_vm1 }
0x1091   :  { %v608_v16 = vsub.f32 1.0, %v607_v15 }
0x1093   :  { %v609_v17 = vmul.f32 %v799_v14, %v608_v16 }
0x1095   :  { %v610_v18 = vadd.f32 %v799_v14, %v609_v17 }
0x1097   :  { %v614_v21 = vsel %vm613_vm3, %v799_v14, %v610_v18 }
0x1098   :  { %v619_v24 = vsel %vm616_vm4, %v618_v22, %v614_v21 }
0x1099   :  { %v622_v26 = vmul.f32 %v619_v24, %v564_v1  ;;  %v736_v1 = vld [vmem:[%s1018_s4] ss:$0 sm:$0xff] }
0x10f6   :  { %v625_v23 = vpop.permute.xlu1 %624 }
0x10f7   :  { %v627_v25 = vmul.f32 %v625_v23, %v619_v24 }
0x10f9   :  { %629 = vrot.lane.b32.xlu2 %v627_v25, %s862_s3 }
0x1153   :  { %v630_v27 = vpop.permute.xlu2 %629 }
0x1154   :  { %v632_v28 = vadd.f32 %v630_v27, %v622_v26 }
0x1156   :  { %800 = vtanh.f32 %v632_v28 }
0x115c   :  { %v801_v29 = vpop.eup %800 }
0x115d   :  { %635 = vrot.lane.b32.xlu0 %v801_v29, %s861_s11 }
0x11cf   :  { %v636_v30 = vpop.permute.xlu0 %635 }
0x11d0   :  { %v638_v31 = vmul.f32 %v636_v30, %v619_v24 }
0x11d2   :  { %640 = vrot.lane.b32.xlu1 %v638_v31, %s862_s3 }
0x1244   :  { %v641_v32 = vpop.permute.xlu1 %640 }
0x1245   :  { %727 = vst.msk [vmem:[%s1020_s6 + $0xe] sm:$0x3] %vm167_vm5, %v641_v32 }
0x124c   :  { %v646_v34 = vld [vmem:[%s1020_s6 + $0x8] sm:$0xff] }
0x124d   :  { %v648_v36 = vsel %vm65_vm0, %v646_v34, 0.0 }
0x124e   :  { %v649_v37 = vadd.f32 %v648_v36, %v647_v35 }
0x1250   :  { %v650_v38 = vrot.slane %v649_v37, 4 }
0x1252   :  { %v651_v39 = vadd.f32 %v650_v38, %v649_v37 }
0x1254   :  { %v652_v40 = vrot.slane %v651_v39, 2 }
0x1256   :  { %v653_v41 = vadd.f32 %v652_v40, %v651_v39 }
0x1258   :  { %v654_v42 = vrot.slane %v653_v41, 1 }
0x125a   :  { %v655_v43 = vadd.f32 %v654_v42, %v653_v41 }
0x125c   :  { %v656_v44 = vmul.f32 0.0625, %v655_v43 }
0x125e   :  { %v657_v45 = vsub.f32 %v645_v33, %v656_v44  ;;  %v658_v46 = vsub.f32 %v646_v34, %v656_v44 }
0x1260   :  { %v659_v47 = vmul.f32 %v657_v45, %v657_v45  ;;  %v660_v48 = vmul.f32 %v658_v46, %v658_v46 }
0x1262   :  { %v661_v49 = vsel %vm65_vm0, %v659_v47, 0.0  ;;  %v662_v50 = vsel %vm65_vm0, %v660_v48, 0.0 }
0x1263   :  { %v663_v51 = vadd.f32 %v662_v50, %v661_v49 }
0x1265   :  { %v664_v52 = vrot.slane %v663_v51, 4 }
0x1267   :  { %v665_v53 = vadd.f32 %v664_v52, %v663_v51 }
0x1269   :  { %v666_v54 = vrot.slane %v665_v53, 2 }
0x126b   :  { %v667_v55 = vadd.f32 %v666_v54, %v665_v53 }
0x126d   :  { %v668_v56 = vrot.slane %v667_v55, 1 }
0x126f   :  { %v669_v57 = vadd.f32 %v668_v56, %v667_v55 }
0x1271   :  { %v670_v58 = vmul.f32 0.0625, %v669_v57 }
0x1273   :  { %v671_v59 = vadd.f32 1e-05, %v670_v58 }
0x1275   :  { %802 = vrsqrt.f32 %v671_v59  ;;  %vm678_vm6 = vweird.f32 %v671_v59 }
0x127b   :  { %v803_v60 = vpop.eup %802 }
0x127c   :  { %v673_v61 = vmul.f32 %v803_v60, %v671_v59  ;;  %vm679_vm5 = vweird.f32 %v803_v60 }
0x127d   :  { %vm680_vm7 = vmor %vm678_vm6, %vm679_vm5 }
0x127e   :  { %v674_v62 = vmul.f32 %v803_v60, %v673_v61 }
0x1280   :  { %v675_v10 = vmul.f32 0.5, %v674_v62 }
0x1282   :  { %v676_v63 = vsub.f32 1.5, %v675_v10 }
0x1284   :  { %v677_v0 = vmul.f32 %v803_v60, %v676_v63 }
0x1286   :  { %v681_v2 = vsel %vm680_vm7, %v803_v60, %v677_v0 }
0x1287   :  { %v682_v4 = vmul.f32 %v681_v2, %v657_v45  ;;  %v683_v5 = vmul.f32 %v681_v2, %v658_v46 }
0x1289   :  { %v688_v6 = vmul.f32 %v736_v1, %v682_v4  ;;  %v689_v7 = vmul.f32 %v736_v1, %v683_v5 }
0x128b   :  { %v694_v8 = vadd.f32 %v737_v3, %v688_v6  ;;  %v695_v9 = vadd.f32 %v737_v3, %v689_v7 }
0x128d   :  { %696 = vst.msk [vmem:[%s1020_s6] sm:$0xff] %vm65_vm0, %v694_v8 }
0x128e   :  { %697 = vst.msk [vmem:[%s1020_s6 + $0x8] sm:$0xff] %vm65_vm0, %v695_v9 }
0x128f   :  { %702 = vsyncpa [#allocation4], 1 }
0x1290   :  { %703 = vsyncpa [#allocation6], 1 }

// kernel: group_rnn_forward.2
= control target key start
LH: loop header
LB: loop body
LE: loop exit
PB: predicated region body
PF: predicated region fallthrough
CT: control target
= control target key end

     0   :  { %11 = vsyncpa [#allocation4], 0  ;;  %s811_s24 = smov [#allocation3]   ;;  %s812_s26 = smov 128   ;;  %s977_s0 = inlined_call_operand.vmem [shape: f32[16,16], index: 0, kind: input, shape index: {}]   ;;  %s978_s1 = inlined_call_operand.hbm [shape: f32[16,128], index: 1, kind: input, shape index: {}]   ;;  %s979_s2 = inlined_call_operand.vmem [shape: f32[32,128], index: 2, kind: input, shape index: {}]   ;;  %s980_s3 = inlined_call_operand.vmem [shape: f32[1,128], index: 3, kind: input, shape index: {}]   ;;  %s981_s4 = inlined_call_operand.vmem [shape: f32[1,32], index: 4, kind: input, shape index: {}]   ;;  %s982_s5 = inlined_call_operand.vmem [shape: f32[1,32], index: 5, kind: input, shape index: {}]   ;;  %s983_s6 = inlined_call_operand.vmem [shape: f32[16,32], index: 6, kind: output, shape index: {}]  }
   0x1   :  { %s18_s23 = sshll.u32 %s978_s1, 4  ;;  %s20_s25 = sshll.u32 %s811_s24, 4  ;;  %s19_s23 = int_to_ptr.hbm [resolvable:$true] %s18_s23  ;;  %s21_s25 = int_to_ptr.vmem [resolvable:$true] %s20_s25 }
   0x2   :  { %s813_s27 = smov 8  }
   0x3   :  { %26 = dma.hbm_to_vmem [thread:$0]  %s19_s23, 256, %s21_s25, [#allocation4], %s812_s26, %s812_s26, %s813_s27  }
   0x4   :  { %809 = dma.done.wait [#allocation4], 256  }
   0x5   :  { %810 = vsyncadd [#allocation4], 4294967040  ;;  %v42_v0 = vld [vmem:[#allocation3 + $0x8] sm:$0xff]  ;;  %v41_v1 = vld [vmem:[#allocation3] sm:$0xff]  ;;  %vm47_vm0 = vcmask 130048   ;;  %v814_v7 = vmov 0.0  }
   0x6   :  { %68 = vmatpush.msra.mxu0 %v42_v0  ;;  %v39_v2 = vld [vmem:[%s977_s0] sm:$0xff]  ;;  %v82_v3 = vld [vmem:[%s979_s2 + $0x18] sm:$0xff]  ;;  %v81_v4 = vld [vmem:[%s979_s2 + $0x10] sm:$0xff]  ;;  %s815_s14 = smov 64   ;;  %vm150_vm5 = vcmask 254976   ;;  %vm84_vm6 = vcmask 261120  }
   0x7   :  { %100 = vmatpush.msra.mxu1 %v82_v3  ;;  %168 = vmatpush.msra.mxu2 %v82_v3  ;;  %v80_v5 = vld [vmem:[%s979_s2 + $0x8] sm:$0xff]  ;;  %v79_v6 = vld [vmem:[%s979_s2] sm:$0xff] }
   0x8   :  { %69 = vmatpush.msra.mxu0 %v41_v1  ;;  %236 = vmatpush.msra.mxu3 %v82_v3  ;;  %v874_v8 = vld [vmem:[%s980_s3] ss:$0 sm:$0xff]  ;;  %s816_s3 = smov 32  }
   0x9   :  { %686 = vmatmul.msk.f32.vlgmr.msra.gmra.mxu0 %vm47_vm0, %v39_v2  ;;  %101 = vmatpush.msra.mxu1 %v81_v4 }
   0xa   :  { %169 = vmatpush.msra.mxu2 %v81_v4  ;;  %237 = vmatpush.msra.mxu3 %v81_v4 }
   0xb   :  { %102 = vmatpush.msra.mxu1 %v80_v5  ;;  %508 = vmatpush.msrb.mxu0 %v82_v3 }
   0xc   :  { %170 = vmatpush.msra.mxu2 %v80_v5  ;;  %238 = vmatpush.msra.mxu3 %v80_v5 }
   0xd   :  { %103 = vmatpush.msra.mxu1 %v79_v6  ;;  %509 = vmatpush.msrb.mxu0 %v81_v4 }
   0xe   :  { %104 = vmatmul.f32.vlgmr.msra.gmra.mxu1 %v814_v7  ;;  %171 = vmatpush.msra.mxu2 %v79_v6 }
   0xf   :  { %239 = vmatpush.msra.mxu3 %v79_v6  ;;  %304 = vmatpush.msrb.mxu1 %v82_v3 }
  0x10   :  { %372 = vmatpush.msrb.mxu2 %v82_v3  ;;  %510 = vmatpush.msrb.mxu0 %v80_v5 }
  0x11   :  { %440 = vmatpush.msrb.mxu3 %v82_v3  ;;  %305 = vmatpush.msrb.mxu1 %v81_v4 }
  0x12   :  { %373 = vmatpush.msrb.mxu2 %v81_v4  ;;  %511 = vmatpush.msrb.mxu0 %v79_v6 }
  0x13   :  { %441 = vmatpush.msrb.mxu3 %v81_v4  ;;  %306 = vmatpush.msrb.mxu1 %v80_v5 }
  0x14   :  { %374 = vmatpush.msrb.mxu2 %v80_v5 }
  0x15   :  { %442 = vmatpush.msrb.mxu3 %v80_v5  ;;  %307 = vmatpush.msrb.mxu1 %v79_v6 }
  0x16   :  { %375 = vmatpush.msrb.mxu2 %v79_v6 }
  0x17   :  { %443 = vmatpush.msrb.mxu3 %v79_v6  ;;  %576 = vmatpush.msra.mxu1 %v82_v3 }
  0x19   :  { %577 = vmatpush.msra.mxu1 %v81_v4 }
  0x1b   :  { %578 = vmatpush.msra.mxu1 %v80_v5 }
  0x1d   :  { %579 = vmatpush.msra.mxu1 %v79_v6 }
  0x86   :  { %v71_v9 = vpop.f32.mrf.mxu0 }
  0x87   :  { %v72_v10 = vadd.f32 %v874_v8, %v71_v9 }
  0x89   :  { %77 = vst [vmem:[#allocation2] sm:$0xff] %v72_v10 }
  0x8b   :  { %v105_v11 = vpop.f32.mrf.mxu1 }
  0x90   :  { %v83_v12 = vld [vmem:[#allocation2] sm:$0x3]  ;;  %v153_v37 = vld [vmem:[#allocation2 + $0x2] sm:$0x3]  ;;  %v221_v63 = vld [vmem:[#allocation2 + $0x4] sm:$0x3] }
  0x91   :  { %v108_v13 = vadd.f32 %v105_v11, %v83_v12 }
  0x93   :  { %719 = vtanh.f32 %v108_v13  ;;  %v688_v15 = vmul.f32 -1.442695, %v108_v13 }
  0x95   :  { %721 = vpow2.f32 %v688_v15 }
  0x99   :  { %v720_v14 = vpop.eup %719 }
  0x9a   :  { %131 = vrot.lane.b32.xlu0 %v720_v14, %s815_s14 }
  0x9b   :  { %v722_v16 = vpop.eup %721 }
  0x9c   :  { %v112_v17 = vadd.f32 1.0, %v722_v16 }
  0x9e   :  { %723 = vrcp.f32 %v112_v17  ;;  %v124_v23 = vand.u32 2147483648, %v112_v17  ;;  %vm118_vm2 = vweird.f32 %v112_v17  ;;  %v122_v24 = vand.u32 2147483647, %v112_v17 }
  0xa0   :  { %v125_v26 = vor.u32 1.1754944e-38, %v124_v23  ;;  %vm123_vm4 = vcmp.eq.f32.partialorder %v122_v24, 8.507059e+37 }
  0xa4   :  { %v724_v18 = vpop.eup %723 }
  0xa5   :  { %v114_v19 = vmul.f32 %v724_v18, %v112_v17  ;;  %vm119_vm1 = vweird.f32 %v724_v18 }
  0xa6   :  { %vm120_vm3 = vmor %vm118_vm2, %vm119_vm1 }
  0xa7   :  { %v115_v20 = vsub.f32 1.0, %v114_v19 }
  0xa9   :  { %v116_v21 = vmul.f32 %v724_v18, %v115_v20 }
  0xab   :  { %v117_v22 = vadd.f32 %v724_v18, %v116_v21 }
  0xad   :  { %v121_v25 = vsel %vm120_vm3, %v724_v18, %v117_v22 }
  0xae   :  { %v126_v28 = vsel %vm123_vm4, %v125_v26, %v121_v25  ;;  %v289_v26 = vld [vmem:[#allocation2 + $0x6] sm:$0x3] }
  0xaf   :  { %v129_v30 = vmul.f32 0.0, %v126_v28 }
 0x10c   :  { %v132_v27 = vpop.permute.xlu0 %131 }
 0x10d   :  { %v134_v29 = vmul.f32 %v132_v27, %v126_v28 }
 0x10f   :  { %136 = vrot.lane.b32.xlu0 %v134_v29, %s816_s3 }
 0x181   :  { %v137_v31 = vpop.permute.xlu0 %136 }
 0x182   :  { %v139_v32 = vadd.f32 %v137_v31, %v129_v30 }
 0x184   :  { %725 = vtanh.f32 %v139_v32 }
 0x18a   :  { %v726_v33 = vpop.eup %725 }
 0x18b   :  { %142 = vrot.lane.b32.xlu1 %v726_v33, %s815_s14 }
 0x1fd   :  { %v143_v34 = vpop.permute.xlu1 %142 }
 0x1fe   :  { %v145_v35 = vmul.f32 %v143_v34, %v126_v28 }
 0x200   :  { %147 = vrot.lane.b32.xlu1 %v145_v35, %s816_s3 }
 0x272   :  { %v148_v36 = vpop.permute.xlu1 %147 }
 0x273   :  { %151 = vst.msk [vmem:[%s983_s6] sm:$0x3] %vm150_vm5, %v148_v36  ;;  %689 = vmatmul.msk.f32.vlgmr.msra.gmra.mxu2 %vm84_vm6, %v148_v36 }
 0x2f6   :  { %v173_v38 = vpop.f32.mrf.mxu2 }
 0x2f7   :  { %v176_v39 = vadd.f32 %v173_v38, %v153_v37 }
 0x2f9   :  { %727 = vtanh.f32 %v176_v39  ;;  %v690_v41 = vmul.f32 -1.442695, %v176_v39 }
 0x2fb   :  { %729 = vpow2.f32 %v690_v41 }
 0x2ff   :  { %v728_v40 = vpop.eup %727 }
 0x300   :  { %199 = vrot.lane.b32.xlu2 %v728_v40, %s815_s14 }
 0x301   :  { %v730_v42 = vpop.eup %729 }
 0x302   :  { %v180_v43 = vadd.f32 1.0, %v730_v42 }
 0x304   :  { %731 = vrcp.f32 %v180_v43  ;;  %v192_v49 = vand.u32 2147483648, %v180_v43  ;;  %vm186_vm8 = vweird.f32 %v180_v43  ;;  %v190_v50 = vand.u32 2147483647, %v180_v43 }
 0x306   :  { %v193_v52 = vor.u32 1.1754944e-38, %v192_v49  ;;  %vm191_vm10 = vcmp.eq.f32.partialorder %v190_v50, 8.507059e+37  ;;  %v40_v49 = vld [vmem:[%s977_s0 + $0x8] sm:$0xff] }
 0x307   :  { %687 = vmatmul.msk.f32.gmra.mxu0 %vm47_vm0, %v40_v49 }
 0x30a   :  { %v732_v44 = vpop.eup %731 }
 0x30b   :  { %v182_v45 = vmul.f32 %v732_v44, %v180_v43  ;;  %vm187_vm7 = vweird.f32 %v732_v44 }
 0x30c   :  { %vm188_vm9 = vmor %vm186_vm8, %vm187_vm7 }
 0x30d   :  { %v183_v46 = vsub.f32 1.0, %v182_v45 }
 0x30f   :  { %v184_v47 = vmul.f32 %v732_v44, %v183_v46 }
 0x311   :  { %v185_v48 = vadd.f32 %v732_v44, %v184_v47 }
 0x313   :  { %v189_v51 = vsel %vm188_vm9, %v732_v44, %v185_v48 }
 0x314   :  { %v194_v54 = vsel %vm191_vm10, %v193_v52, %v189_v51 }
 0x315   :  { %v197_v56 = vmul.f32 %v194_v54, %v139_v32 }
 0x35a   :  { %v200_v53 = vpop.permute.xlu2 %199 }
 0x35b   :  { %v202_v55 = vmul.f32 %v200_v53, %v194_v54 }
 0x35d   :  { %204 = vrot.lane.b32.xlu2 %v202_v55, %s816_s3 }
 0x384   :  { %v74_v52 = vpop.f32.mrf.mxu0 }
 0x385   :  { %v75_v53 = vadd.f32 %v874_v8, %v74_v52 }
 0x387   :  { %78 = vst [vmem:[#allocation2 + $0x8] sm:$0xff] %v75_v53 }
 0x38e   :  { %v357_v55 = vld [vmem:[#allocation2 + $0x8] sm:$0x3] }
 0x3b7   :  { %v205_v57 = vpop.permute.xlu2 %204 }
 0x3b8   :  { %v207_v58 = vadd.f32 %v205_v57, %v197_v56 }
 0x3ba   :  { %733 = vtanh.f32 %v207_v58 }
 0x3c0   :  { %v734_v59 = vpop.eup %733 }
 0x3c1   :  { %210 = vrot.lane.b32.xlu0 %v734_v59, %s815_s14 }
 0x433   :  { %v211_v60 = vpop.permute.xlu0 %210 }
 0x434   :  { %v213_v61 = vmul.f32 %v211_v60, %v194_v54 }
 0x436   :  { %215 = vrot.lane.b32.xlu1 %v213_v61, %s816_s3 }
 0x4a8   :  { %v216_v62 = vpop.permute.xlu1 %215 }
 0x4a9   :  { %691 = vst.msk [vmem:[%s983_s6 + $0x2] sm:$0x3] %vm150_vm5, %v216_v62  ;;  %692 = vmatmul.msk.f32.vlgmr.msra.gmra.mxu3 %vm84_vm6, %v216_v62 }
 0x52c   :  { %v241_v0 = vpop.f32.mrf.mxu3 }
 0x52d   :  { %v244_v1 = vadd.f32 %v241_v0, %v221_v63 }
 0x52f   :  { %735 = vtanh.f32 %v244_v1  ;;  %v693_v3 = vmul.f32 -1.442695, %v244_v1 }
 0x531   :  { %737 = vpow2.f32 %v693_v3 }
 0x535   :  { %v736_v2 = vpop.eup %735 }
 0x536   :  { %267 = vrot.lane.b32.xlu2 %v736_v2, %s815_s14 }
 0x537   :  { %v738_v4 = vpop.eup %737 }
 0x538   :  { %v248_v5 = vadd.f32 1.0, %v738_v4 }
 0x53a   :  { %739 = vrcp.f32 %v248_v5  ;;  %v260_v12 = vand.u32 2147483648, %v248_v5  ;;  %vm254_vm12 = vweird.f32 %v248_v5  ;;  %v258_v13 = vand.u32 2147483647, %v248_v5 }
 0x53c   :  { %v261_v15 = vor.u32 1.1754944e-38, %v260_v12  ;;  %vm259_vm14 = vcmp.eq.f32.partialorder %v258_v13, 8.507059e+37 }
 0x540   :  { %v740_v6 = vpop.eup %739 }
 0x541   :  { %v250_v7 = vmul.f32 %v740_v6, %v248_v5  ;;  %vm255_vm11 = vweird.f32 %v740_v6 }
 0x542   :  { %vm256_vm13 = vmor %vm254_vm12, %vm255_vm11 }
 0x543   :  { %v251_v9 = vsub.f32 1.0, %v250_v7 }
 0x545   :  { %v252_v10 = vmul.f32 %v740_v6, %v251_v9 }
 0x547   :  { %v253_v11 = vadd.f32 %v740_v6, %v252_v10 }
 0x549   :  { %v257_v14 = vsel %vm256_vm13, %v740_v6, %v253_v11 }
 0x54a   :  { %v262_v17 = vsel %vm259_vm14, %v261_v15, %v257_v14 }
 0x54b   :  { %v265_v19 = vmul.f32 %v262_v17, %v207_v58 }
 0x590   :  { %v268_v16 = vpop.permute.xlu2 %267 }
 0x591   :  { %v270_v18 = vmul.f32 %v268_v16, %v262_v17 }
 0x593   :  { %272 = vrot.lane.b32.xlu0 %v270_v18, %s816_s3 }
 0x605   :  { %v273_v20 = vpop.permute.xlu0 %272 }
 0x606   :  { %v275_v21 = vadd.f32 %v273_v20, %v265_v19 }
 0x608   :  { %741 = vtanh.f32 %v275_v21 }
 0x60e   :  { %v742_v22 = vpop.eup %741 }
 0x60f   :  { %278 = vrot.lane.b32.xlu1 %v742_v22, %s815_s14 }
 0x681   :  { %v279_v23 = vpop.permute.xlu1 %278 }
 0x682   :  { %v281_v24 = vmul.f32 %v279_v23, %v262_v17  ;;  %v425_v17 = vld [vmem:[#allocation2 + $0xa] sm:$0x3] }
 0x684   :  { %283 = vrot.lane.b32.xlu2 %v281_v24, %s816_s3 }
 0x6de   :  { %v284_v25 = vpop.permute.xlu2 %283 }
 0x6df   :  { %694 = vst.msk [vmem:[%s983_s6 + $0x4] sm:$0x3] %vm150_vm5, %v284_v25  ;;  %695 = vmatmul.msk.f32.vlgmr.msrb.gmra.mxu1 %vm84_vm6, %v284_v25 }
 0x75c   :  { %v309_v27 = vpop.f32.mrf.mxu1 }
 0x75d   :  { %v312_v28 = vadd.f32 %v309_v27, %v289_v26 }
 0x75f   :  { %743 = vtanh.f32 %v312_v28  ;;  %v696_v30 = vmul.f32 -1.442695, %v312_v28 }
 0x761   :  { %745 = vpow2.f32 %v696_v30 }
 0x765   :  { %v744_v29 = vpop.eup %743 }
 0x766   :  { %335 = vrot.lane.b32.xlu0 %v744_v29, %s815_s14 }
 0x767   :  { %v746_v31 = vpop.eup %745 }
 0x768   :  { %v316_v32 = vadd.f32 1.0, %v746_v31 }
 0x76a   :  { %747 = vrcp.f32 %v316_v32  ;;  %v328_v38 = vand.u32 2147483648, %v316_v32  ;;  %vm322_vm1 = vweird.f32 %v316_v32  ;;  %v326_v39 = vand.u32 2147483647, %v316_v32 }
 0x76c   :  { %v329_v41 = vor.u32 1.1754944e-38, %v328_v38  ;;  %vm327_vm3 = vcmp.eq.f32.partialorder %v326_v39, 8.507059e+37 }
 0x770   :  { %v748_v33 = vpop.eup %747 }
 0x771   :  { %v318_v34 = vmul.f32 %v748_v33, %v316_v32  ;;  %vm323_vm15 = vweird.f32 %v748_v33 }
 0x772   :  { %vm324_vm2 = vmor %vm322_vm1, %vm323_vm15 }
 0x773   :  { %v319_v35 = vsub.f32 1.0, %v318_v34 }
 0x775   :  { %v320_v36 = vmul.f32 %v748_v33, %v319_v35 }
 0x777   :  { %v321_v37 = vadd.f32 %v748_v33, %v320_v36 }
 0x779   :  { %v325_v40 = vsel %vm324_vm2, %v748_v33, %v321_v37 }
 0x77a   :  { %v330_v43 = vsel %vm327_vm3, %v329_v41, %v325_v40 }
 0x77b   :  { %v333_v45 = vmul.f32 %v330_v43, %v275_v21 }
 0x7d8   :  { %v336_v42 = vpop.permute.xlu0 %335 }
 0x7d9   :  { %v338_v44 = vmul.f32 %v336_v42, %v330_v43 }
 0x7db   :  { %340 = vrot.lane.b32.xlu1 %v338_v44, %s816_s3 }
 0x84d   :  { %v341_v46 = vpop.permute.xlu1 %340 }
 0x84e   :  { %v343_v47 = vadd.f32 %v341_v46, %v333_v45 }
 0x850   :  { %749 = vtanh.f32 %v343_v47 }
 0x856   :  { %v750_v48 = vpop.eup %749 }
 0x857   :  { %346 = vrot.lane.b32.xlu2 %v750_v48, %s815_s14 }
 0x8b1   :  { %v347_v50 = vpop.permute.xlu2 %346 }
 0x8b2   :  { %v349_v51 = vmul.f32 %v347_v50, %v330_v43  ;;  %v493_v43 = vld [vmem:[#allocation2 + $0xc] sm:$0x3] }
 0x8b4   :  { %351 = vrot.lane.b32.xlu0 %v349_v51, %s816_s3 }
 0x926   :  { %v352_v54 = vpop.permute.xlu0 %351 }
 0x927   :  { %697 = vst.msk [vmem:[%s983_s6 + $0x6] sm:$0x3] %vm150_vm5, %v352_v54  ;;  %698 = vmatmul.msk.f32.vlgmr.msrb.gmra.mxu2 %vm84_vm6, %v352_v54 }
 0x9aa   :  { %v377_v56 = vpop.f32.mrf.mxu2 }
 0x9ab   :  { %v380_v57 = vadd.f32 %v377_v56, %v357_v55 }
 0x9ad   :  { %751 = vtanh.f32 %v380_v57  ;;  %v699_v59 = vmul.f32 -1.442695, %v380_v57 }
 0x9af   :  { %753 = vpow2.f32 %v699_v59 }
 0x9b3   :  { %v752_v58 = vpop.eup %751 }
 0x9b4   :  { %403 = vrot.lane.b32.xlu1 %v752_v58, %s815_s14 }
 0x9b5   :  { %v754_v60 = vpop.eup %753 }
 0x9b6   :  { %v384_v8 = vadd.f32 1.0, %v754_v60 }
 0x9b8   :  { %755 = vrcp.f32 %v384_v8  ;;  %v396_v2 = vand.u32 2147483648, %v384_v8  ;;  %vm390_vm4 = vweird.f32 %v384_v8  ;;  %v394_v3 = vand.u32 2147483647, %v384_v8 }
 0x9ba   :  { %v397_v5 = vor.u32 1.1754944e-38, %v396_v2  ;;  %vm395_vm8 = vcmp.eq.f32.partialorder %v394_v3, 8.507059e+37 }
 0x9be   :  { %v756_v61 = vpop.eup %755 }
 0x9bf   :  { %v386_v62 = vmul.f32 %v756_v61, %v384_v8  ;;  %vm391_vm0 = vweird.f32 %v756_v61 }
 0x9c0   :  { %vm392_vm7 = vmor %vm390_vm4, %vm391_vm0 }
 0x9c1   :  { %v387_v63 = vsub.f32 1.0, %v386_v62 }
 0x9c3   :  { %v388_v0 = vmul.f32 %v756_v61, %v387_v63 }
 0x9c5   :  { %v389_v1 = vadd.f32 %v756_v61, %v388_v0 }
 0x9c7   :  { %v393_v4 = vsel %vm392_vm7, %v756_v61, %v389_v1 }
 0x9c8   :  { %v398_v7 = vsel %vm395_vm8, %v397_v5, %v393_v4  ;;  %v561_v4 = vld [vmem:[#allocation2 + $0xe] sm:$0x3] }
 0x9c9   :  { %v401_v10 = vmul.f32 %v398_v7, %v343_v47 }
 0xa26   :  { %v404_v6 = vpop.permute.xlu1 %403 }
 0xa27   :  { %v406_v9 = vmul.f32 %v404_v6, %v398_v7 }
 0xa29   :  { %408 = vrot.lane.b32.xlu2 %v406_v9, %s816_s3 }
 0xa83   :  { %v409_v11 = vpop.permute.xlu2 %408 }
 0xa84   :  { %v411_v12 = vadd.f32 %v409_v11, %v401_v10 }
 0xa86   :  { %757 = vtanh.f32 %v411_v12 }
 0xa8c   :  { %v758_v13 = vpop.eup %757 }
 0xa8d   :  { %414 = vrot.lane.b32.xlu0 %v758_v13, %s815_s14 }
 0xaff   :  { %v415_v14 = vpop.permute.xlu0 %414 }
 0xb00   :  { %v417_v15 = vmul.f32 %v415_v14, %v398_v7 }
 0xb02   :  { %419 = vrot.lane.b32.xlu1 %v417_v15, %s816_s3 }
 0xb74   :  { %v420_v16 = vpop.permute.xlu1 %419 }
 0xb75   :  { %700 = vst.msk [vmem:[%s983_s6 + $0x8] sm:$0x3] %vm150_vm5, %v420_v16  ;;  %701 = vmatmul.msk.f32.vlgmr.msrb.gmra.mxu3 %vm84_vm6, %v420_v16 }
 0xbf8   :  { %v445_v18 = vpop.f32.mrf.mxu3 }
 0xbf9   :  { %v448_v19 = vadd.f32 %v445_v18, %v425_v17 }
 0xbfb   :  { %759 = vtanh.f32 %v448_v19  ;;  %v702_v21 = vmul.f32 -1.442695, %v448_v19 }
 0xbfd   :  { %761 = vpow2.f32 %v702_v21 }
 0xc01   :  { %v760_v20 = vpop.eup %759 }
 0xc02   :  { %471 = vrot.lane.b32.xlu2 %v760_v20, %s815_s14 }
 0xc03   :  { %v762_v22 = vpop.eup %761 }
 0xc04   :  { %v452_v23 = vadd.f32 1.0, %v762_v22 }
 0xc06   :  { %763 = vrcp.f32 %v452_v23  ;;  %v464_v29 = vand.u32 2147483648, %v452_v23  ;;  %vm458_vm10 = vweird.f32 %v452_v23  ;;  %v462_v30 = vand.u32 2147483647, %v452_v23 }
 0xc08   :  { %v465_v32 = vor.u32 1.1754944e-38, %v464_v29  ;;  %vm463_vm12 = vcmp.eq.f32.partialorder %v462_v30, 8.507059e+37 }
 0xc0c   :  { %v764_v24 = vpop.eup %763 }
 0xc0d   :  { %v454_v25 = vmul.f32 %v764_v24, %v452_v23  ;;  %vm459_vm9 = vweird.f32 %v764_v24 }
 0xc0e   :  { %vm460_vm11 = vmor %vm458_vm10, %vm459_vm9 }
 0xc0f   :  { %v455_v26 = vsub.f32 1.0, %v454_v25 }
 0xc11   :  { %v456_v27 = vmul.f32 %v764_v24, %v455_v26 }
 0xc13   :  { %v457_v28 = vadd.f32 %v764_v24, %v456_v27 }
 0xc15   :  { %v461_v31 = vsel %vm460_vm11, %v764_v24, %v457_v28 }
 0xc16   :  { %v466_v34 = vsel %vm463_vm12, %v465_v32, %v461_v31  ;;  %v628_v31 = vld [vmem:[%s983_s6] sm:$0xff] }
 0xc17   :  { %v469_v36 = vmul.f32 %v466_v34, %v411_v12 }
 0xc5c   :  { %v472_v33 = vpop.permute.xlu2 %471 }
 0xc5d   :  { %v474_v35 = vmul.f32 %v472_v33, %v466_v34  ;;  %v630_v33 = vsel %vm84_vm6, %v628_v31, 0.0 }
 0xc5f   :  { %476 = vrot.lane.b32.xlu0 %v474_v35, %s816_s3 }
 0xcd1   :  { %v477_v37 = vpop.permute.xlu0 %476 }
 0xcd2   :  { %v479_v38 = vadd.f32 %v477_v37, %v469_v36 }
 0xcd4   :  { %765 = vtanh.f32 %v479_v38 }
 0xcda   :  { %v766_v39 = vpop.eup %765 }
 0xcdb   :  { %482 = vrot.lane.b32.xlu1 %v766_v39, %s815_s14 }
 0xd4d   :  { %v483_v40 = vpop.permute.xlu1 %482 }
 0xd4e   :  { %v485_v41 = vmul.f32 %v483_v40, %v466_v34 }
 0xd50   :  { %487 = vrot.lane.b32.xlu2 %v485_v41, %s816_s3 }
 0xdaa   :  { %v488_v42 = vpop.permute.xlu2 %487 }
 0xdab   :  { %703 = vst.msk [vmem:[%s983_s6 + $0xa] sm:$0x3] %vm150_vm5, %v488_v42  ;;  %704 = vmatmul.msk.f32.vlgmr.msrb.gmra.mxu0 %vm84_vm6, %v488_v42 }
 0xe28   :  { %v513_v44 = vpop.f32.mrf.mxu0 }
 0xe29   :  { %v516_v45 = vadd.f32 %v513_v44, %v493_v43 }
 0xe2b   :  { %767 = vtanh.f32 %v516_v45  ;;  %v705_v47 = vmul.f32 -1.442695, %v516_v45 }
 0xe2d   :  { %769 = vpow2.f32 %v705_v47 }
 0xe31   :  { %v768_v46 = vpop.eup %767 }
 0xe32   :  { %539 = vrot.lane.b32.xlu0 %v768_v46, %s815_s14 }
 0xe33   :  { %v770_v48 = vpop.eup %769 }
 0xe34   :  { %v520_v49 = vadd.f32 1.0, %v770_v48 }
 0xe36   :  { %771 = vrcp.f32 %v520_v49  ;;  %v532_v55 = vand.u32 2147483648, %v520_v49  ;;  %vm526_vm14 = vweird.f32 %v520_v49  ;;  %v530_v56 = vand.u32 2147483647, %v520_v49 }
 0xe38   :  { %v533_v58 = vor.u32 1.1754944e-38, %v532_v55  ;;  %vm531_vm1 = vcmp.eq.f32.partialorder %v530_v56, 8.507059e+37 }
 0xe3c   :  { %v772_v50 = vpop.eup %771 }
 0xe3d   :  { %v522_v51 = vmul.f32 %v772_v50, %v520_v49  ;;  %vm527_vm13 = vweird.f32 %v772_v50 }
 0xe3e   :  { %vm528_vm15 = vmor %vm526_vm14, %vm527_vm13 }
 0xe3f   :  { %v523_v52 = vsub.f32 1.0, %v522_v51 }
 0xe41   :  { %v524_v53 = vmul.f32 %v772_v50, %v523_v52 }
 0xe43   :  { %v525_v54 = vadd.f32 %v772_v50, %v524_v53 }
 0xe45   :  { %v529_v57 = vsel %vm528_vm15, %v772_v50, %v525_v54 }
 0xe46   :  { %v534_v60 = vsel %vm531_vm1, %v533_v58, %v529_v57 }
 0xe47   :  { %v537_v61 = vmul.f32 %v534_v60, %v479_v38 }
 0xea4   :  { %v540_v59 = vpop.permute.xlu0 %539 }
 0xea5   :  { %v542_v8 = vmul.f32 %v540_v59, %v534_v60 }
 0xea7   :  { %544 = vrot.lane.b32.xlu1 %v542_v8, %s816_s3 }
 0xf19   :  { %v545_v62 = vpop.permute.xlu1 %544 }
 0xf1a   :  { %v547_v63 = vadd.f32 %v545_v62, %v537_v61 }
 0xf1c   :  { %773 = vtanh.f32 %v547_v63 }
 0xf22   :  { %v774_v0 = vpop.eup %773 }
 0xf23   :  { %550 = vrot.lane.b32.xlu2 %v774_v0, %s815_s14 }
 0xf7d   :  { %v551_v1 = vpop.permute.xlu2 %550 }
 0xf7e   :  { %v553_v2 = vmul.f32 %v551_v1, %v534_v60  ;;  %v718_v1 = vld [vmem:[%s982_s5] ss:$0 sm:$0xff] }
 0xf80   :  { %555 = vrot.lane.b32.xlu0 %v553_v2, %s816_s3 }
 0xff2   :  { %v556_v3 = vpop.permute.xlu0 %555 }
 0xff3   :  { %706 = vst.msk [vmem:[%s983_s6 + $0xc] sm:$0x3] %vm150_vm5, %v556_v3  ;;  %707 = vmatmul.msk.f32.vlgmr.msra.gmra.mxu1 %vm84_vm6, %v556_v3 }
0x1070   :  { %v581_v5 = vpop.f32.mrf.mxu1 }
0x1071   :  { %v584_v6 = vadd.f32 %v581_v5, %v561_v4 }
0x1073   :  { %775 = vtanh.f32 %v584_v6  ;;  %v708_v9 = vmul.f32 -1.442695, %v584_v6 }
0x1075   :  { %777 = vpow2.f32 %v708_v9 }
0x1079   :  { %v776_v7 = vpop.eup %775 }
0x107a   :  { %607 = vrot.lane.b32.xlu1 %v776_v7, %s815_s14 }
0x107b   :  { %v778_v10 = vpop.eup %777 }
0x107c   :  { %v588_v11 = vadd.f32 1.0, %v778_v10 }
0x107e   :  { %779 = vrcp.f32 %v588_v11  ;;  %v600_v17 = vand.u32 2147483648, %v588_v11  ;;  %vm594_vm3 = vweird.f32 %v588_v11  ;;  %v598_v18 = vand.u32 2147483647, %v588_v11 }
0x1080   :  { %v601_v20 = vor.u32 1.1754944e-38, %v600_v17  ;;  %vm599_vm4 = vcmp.eq.f32.partialorder %v598_v18, 8.507059e+37 }
0x1084   :  { %v780_v12 = vpop.eup %779 }
0x1085   :  { %v590_v13 = vmul.f32 %v780_v12, %v588_v11  ;;  %vm595_vm2 = vweird.f32 %v780_v12 }
0x1086   :  { %vm596_vm0 = vmor %vm594_vm3, %vm595_vm2 }
0x1087   :  { %v591_v14 = vsub.f32 1.0, %v590_v13 }
0x1089   :  { %v592_v15 = vmul.f32 %v780_v12, %v591_v14 }
0x108b   :  { %v593_v16 = vadd.f32 %v780_v12, %v592_v15 }
0x108d   :  { %v597_v19 = vsel %vm596_vm0, %v780_v12, %v593_v16 }
0x108e   :  { %v602_v22 = vsel %vm599_vm4, %v601_v20, %v597_v19 }
0x108f   :  { %v605_v24 = vmul.f32 %v602_v22, %v547_v63  ;;  %v717_v63 = vld [vmem:[%s981_s4] ss:$0 sm:$0xff] }
0x10ec   :  { %v608_v21 = vpop.permute.xlu1 %607 }
0x10ed   :  { %v610_v23 = vmul.f32 %v608_v21, %v602_v22 }
0x10ef   :  { %612 = vrot.lane.b32.xlu2 %v610_v23, %s816_s3 }
0x1149   :  { %v613_v25 = vpop.permute.xlu2 %612 }
0x114a   :  { %v615_v26 = vadd.f32 %v613_v25, %v605_v24 }
0x114c   :  { %781 = vtanh.f32 %v615_v26 }
0x1152   :  { %v782_v27 = vpop.eup %781 }
0x1153   :  { %618 = vrot.lane.b32.xlu0 %v782_v27, %s815_s14 }
0x11c5   :  { %v619_v28 = vpop.permute.xlu0 %618 }
0x11c6   :  { %v621_v29 = vmul.f32 %v619_v28, %v602_v22 }
0x11c8   :  { %623 = vrot.lane.b32.xlu1 %v621_v29, %s816_s3 }
0x123a   :  { %v624_v30 = vpop.permute.xlu1 %623 }
0x123b   :  { %709 = vst.msk [vmem:[%s983_s6 + $0xe] sm:$0x3] %vm150_vm5, %v624_v30 }
0x1242   :  { %v629_v32 = vld [vmem:[%s983_s6 + $0x8] sm:$0xff] }
0x1243   :  { %v631_v34 = vsel %vm84_vm6, %v629_v32, 0.0 }
0x1244   :  { %v632_v35 = vadd.f32 %v631_v34, %v630_v33 }
0x1246   :  { %v633_v36 = vrot.slane %v632_v35, 4 }
0x1248   :  { %v634_v37 = vadd.f32 %v633_v36, %v632_v35 }
0x124a   :  { %v635_v38 = vrot.slane %v634_v37, 2 }
0x124c   :  { %v636_v39 = vadd.f32 %v635_v38, %v634_v37 }
0x124e   :  { %v637_v40 = vrot.slane %v636_v39, 1 }
0x1250   :  { %v638_v41 = vadd.f32 %v637_v40, %v636_v39 }
0x1252   :  { %v639_v42 = vmul.f32 0.0625, %v638_v41 }
0x1254   :  { %v640_v43 = vsub.f32 %v628_v31, %v639_v42  ;;  %v641_v44 = vsub.f32 %v629_v32, %v639_v42 }
0x1256   :  { %v642_v45 = vmul.f32 %v640_v43, %v640_v43  ;;  %v643_v46 = vmul.f32 %v641_v44, %v641_v44 }
0x1258   :  { %v644_v47 = vsel %vm84_vm6, %v642_v45, 0.0  ;;  %v645_v48 = vsel %vm84_vm6, %v643_v46, 0.0 }
0x1259   :  { %v646_v49 = vadd.f32 %v645_v48, %v644_v47 }
0x125b   :  { %v647_v50 = vrot.slane %v646_v49, 4 }
0x125d   :  { %v648_v51 = vadd.f32 %v647_v50, %v646_v49 }
0x125f   :  { %v649_v52 = vrot.slane %v648_v51, 2 }
0x1261   :  { %v650_v53 = vadd.f32 %v649_v52, %v648_v51 }
0x1263   :  { %v651_v54 = vrot.slane %v650_v53, 1 }
0x1265   :  { %v652_v55 = vadd.f32 %v651_v54, %v650_v53 }
0x1267   :  { %v653_v56 = vmul.f32 0.0625, %v652_v55 }
0x1269   :  { %v654_v57 = vadd.f32 1e-05, %v653_v56 }
0x126b   :  { %783 = vrsqrt.f32 %v654_v57  ;;  %vm661_vm7 = vweird.f32 %v654_v57 }
0x1271   :  { %v784_v58 = vpop.eup %783 }
0x1272   :  { %v656_v59 = vmul.f32 %v784_v58, %v654_v57  ;;  %vm662_vm5 = vweird.f32 %v784_v58 }
0x1273   :  { %vm663_vm8 = vmor %vm661_vm7, %vm662_vm5 }
0x1274   :  { %v657_v60 = vmul.f32 %v784_v58, %v656_v59 }
0x1276   :  { %v658_v8 = vmul.f32 0.5, %v657_v60 }
0x1278   :  { %v659_v61 = vsub.f32 1.5, %v658_v8 }
0x127a   :  { %v660_v62 = vmul.f32 %v784_v58, %v659_v61 }
0x127c   :  { %v664_v0 = vsel %vm663_vm8, %v784_v58, %v660_v62 }
0x127d   :  { %v665_v2 = vmul.f32 %v664_v0, %v640_v43  ;;  %v666_v3 = vmul.f32 %v664_v0, %v641_v44 }
0x127f   :  { %v671_v4 = vmul.f32 %v717_v63, %v665_v2  ;;  %v672_v5 = vmul.f32 %v717_v63, %v666_v3 }
0x1281   :  { %v677_v6 = vadd.f32 %v718_v1, %v671_v4  ;;  %v678_v7 = vadd.f32 %v718_v1, %v672_v5 }
0x1283   :  { %679 = vst.msk [vmem:[%s983_s6] sm:$0xff] %vm84_vm6, %v677_v6 }
0x1284   :  { %680 = vst.msk [vmem:[%s983_s6 + $0x8] sm:$0xff] %vm84_vm6, %v678_v7 }
0x1285   :  { %685 = vsyncpa [#allocation4], 1 }

</bundles_post_ra>
